<compile_context>
chip_gen: v7x
topology: tpu7x:2x2x1
jax: 0.10.0
libtpu: 0.0.40
codegen_flags: <defaults>
</compile_context>

<pallas_src>
import functools

import numpy as np
import jax
import jax.numpy as jnp
from jax import lax
from jax.experimental import pallas as pl
from jax.experimental.pallas import tpu as pltpu


def _round_up(x, m):
    return (x + m - 1) // m * m


def _make_kernel(H, W, W_pad, tile_h, halo, n_inner):
    buf_rows = tile_h + 2 * halo

    def _roll(v, shift, axis):
        # pltpu.roll requires a non-negative shift; rotation by -k == size-k.
        return pltpu.roll(v, shift % v.shape[axis], axis)

    def _pool9(v, axis):
        # max over the centred 9-wide window with 4 maxima (log-step).
        a1 = jnp.maximum(v, jnp.maximum(_roll(v, 1, axis), _roll(v, -1, axis)))
        return jnp.maximum(a1, jnp.maximum(_roll(a1, 3, axis),
                                           _roll(a1, -3, axis)))

    def _psum8(v):
        # (tile_h, W_pad) -> (8, W_pad) sublane-aligned partial sums:
        # pure VPU adds over static aligned slices, no XLU, no masked stores.
        acc = v[0:8, :]
        for k in range(1, tile_h // 8):
            acc = acc + v[8 * k:8 * (k + 1), :]
        return acc

    def kernel(seman_hbm, errmap_ref, errmask_ref, out_ref, xbuf, sem):
        c = pl.program_id(0)            # core shard (parallel axis)
        i = pl.program_id(1)            # row tile within the shard (arbitrary)
        t = c * n_inner + i             # global row-tile index
        slot = lax.rem(i, 2)

        def start_fetch(tile_idx, s):
            row_start = pl.multiple_of(tile_idx * tile_h, 32)
            pltpu.make_async_copy(
                seman_hbm.at[pl.ds(row_start, buf_rows)],
                xbuf.at[s], sem.at[s]).start()

        # ---- prime the pipeline / init the resident accumulator ----
        @pl.when(i == 0)
        def _prime():
            out_ref[...] = jnp.zeros_like(out_ref)
            start_fetch(t, slot)        # slot == 0 here

        # ---- prefetch the next haloed window before any compute ----
        @pl.when(i + 1 < n_inner)
        def _prefetch():
            start_fetch(t + 1, 1 - slot)

        # ---- wait for this tile's haloed semantic-label window ----
        pltpu.make_async_copy(
            seman_hbm.at[pl.ds(0, buf_rows)], xbuf.at[slot],
            sem.at[slot]).wait()

        x = xbuf[slot]                               # (buf_rows, W_pad) f32

        # ---- Sobel, separable; both branches share the row passes ----
        xu = _roll(x, 1, 0)                          # x[r-1, :]
        xd = _roll(x, -1, 0)                         # x[r+1, :]
        r121 = xu + 2.0 * x + xd                     # row taps (1, 2, 1)
        r101 = xu - xd                               # row taps (1, 0, -1)

        gx = _roll(r121, -1, 1) - _roll(r121, 1, 1)
        gy = _roll(r101, 1, 1) + 2.0 * r101 + _roll(r101, -1, 1)
        g = jnp.abs(gx) + jnp.abs(gy)

        # ---- zero the gradient outside the real image (conv/pool boundary);
        #      cheap broadcast masks instead of full-tile iotas ----
        row_id = (lax.broadcasted_iota(jnp.int32, (buf_rows, 1), 0)
                  + (t * tile_h - halo))             # real image row index
        row_ok = ((row_id >= 0) & (row_id < H)).astype(jnp.float32)
        col_ok = (lax.broadcasted_iota(jnp.int32, (1, W_pad), 1)
                  < W).astype(jnp.float32)
        g = g * row_ok * col_ok

        # ---- 9x9 max pool (separable: rows then columns) ----
        gm = _pool9(_pool9(g, 0), 1)

        # central rows of this tile (aligned static slice), threshold
        mask_grad = (gm[halo:halo + tile_h, :] > 0.001).astype(jnp.float32)

        err = errmap_ref[...]                        # f32
        emsk = errmask_ref[...].astype(jnp.float32)  # uint8 {0,1} -> f32

        # ---- aligned 8-row partial sums into the resident accumulator ----
        out_ref[0:8, :] += _psum8(err * mask_grad)   # onborder err
        out_ref[8:16, :] += _psum8(err)              # total err
        out_ref[16:24, :] += _psum8(mask_grad * emsk)  # onborder num
        out_ref[24:32, :] += _psum8(emsk)            # offborder num

    return kernel


@functools.partial(jax.jit, static_argnames=("tile_h",))
def compute_err_on_border(seman_label, err_map, err_mask, *, tile_h=256):
    """Pallas version of ComputeErrOnBorder.forward.

    Returns the per-call increments
        [onborderErr, offborderErr, onborderNum, offborderNum]  (float32).
    """
    x = seman_label[0, 0].astype(jnp.float32)        # (H, W), batch/channel = 1
    H, W = x.shape

    halo = 8                    # >= Sobel(1) + pool(4); keeps 8-sublane alignment
    tile_h = max(32, min(tile_h, _round_up(H, 32)))  # don't over-tile tiny images
    assert tile_h % 32 == 0

    # lane padding: multiple of 128 with >= 4 zero columns of slack (roll-wrap)
    W_pad = _round_up(W, 128)
    if W_pad - W < 4:
        W_pad += 128

    n_shards = 2                                     # both TCs on v7x; harmless on 1-TC parts
    n_tiles = -(-H // tile_h)
    n_inner = -(-n_tiles // n_shards)
    H_tiles = n_shards * n_inner * tile_h
    buf_rows = tile_h + 2 * halo

    # TODO(synk): on v5e this op is purely HBM-bound, so these pad/cast passes
    # (one extra read+write of every input) cost about as much as the kernel;
    # producing err_map / err_mask (thresholded uint8) / seman_label already in
    # the padded layout upstream would remove them.
    seman_p = jnp.pad(x, ((halo, H_tiles - H + halo), (0, W_pad - W)))
    err_p = jnp.pad(err_map.astype(jnp.float32),
                    ((0, H_tiles - H), (0, W_pad - W)))
    msk_p = jnp.pad((err_mask > 0).astype(jnp.uint8),
                    ((0, H_tiles - H), (0, W_pad - W)))

    kernel = _make_kernel(H, W, W_pad, tile_h, halo, n_inner)

    # VMEM budget from actual buffer sizes (v7x only has 64 MiB per TC).
    vmem_bytes = (2 * buf_rows * W_pad * 4           # double-buffered seman window
                  + 2 * tile_h * W_pad * (4 + 1)     # err_map(f32)+err_mask(u8) pipes
                  + 2 * 32 * W_pad * 4               # resident accumulator
                  + 8 * buf_rows * W_pad * 4)        # headroom for live temporaries
    vmem_limit = int(min(max(vmem_bytes, 16 * 1024 * 1024), 56 * 1024 * 1024))

    acc = pl.pallas_call(
        kernel,
        out_shape=jax.ShapeDtypeStruct((n_shards * 32, W_pad), jnp.float32),
        grid_spec=pltpu.PrefetchScalarGridSpec(
            num_scalar_prefetch=0,
            grid=(n_shards, n_inner),
            in_specs=[
                pl.BlockSpec(memory_space=pl.ANY),                   # seman (HBM, manual DMA)
                pl.BlockSpec((tile_h, W_pad),
                             lambda c, i: (c * n_inner + i, 0)),     # err_map
                pl.BlockSpec((tile_h, W_pad),
                             lambda c, i: (c * n_inner + i, 0)),     # err_mask (uint8)
            ],
            out_specs=pl.BlockSpec((32, W_pad), lambda c, i: (c, 0)),  # per-core accumulator
            scratch_shapes=[
                pltpu.VMEM((2, buf_rows, W_pad), jnp.float32),        # double-buffered window
                pltpu.SemaphoreType.DMA((2,)),
            ],
        ),
        compiler_params=pltpu.CompilerParams(
            dimension_semantics=("parallel", "arbitrary"),
            vmem_limit_bytes=vmem_limit,
        ),
    )(seman_p, err_p, msk_p)

    # cheap final reduction over core-shards, sublanes and lanes
    sums = jnp.sum(acc.reshape(n_shards, 4, 8, W_pad), axis=(0, 2, 3))
    on_err, tot_err, on_num, off_num = sums[0], sums[1], sums[2], sums[3]
    return jnp.stack([on_err, tot_err - on_err, on_num, off_num])


# ------------------------ pure-JAX reference (for checking) ---------------

def _reference(seman_label, err_map, err_mask):
    x = seman_label.astype(jnp.float32)
    wx = jnp.array([[-1., 0., 1.], [-2., 0., 2.], [-1., 0., 1.]],
                   jnp.float32).reshape(1, 1, 3, 3)
    wy = jnp.array([[1., 2., 1.], [0., 0., 0.], [-1., -2., -1.]],
                   jnp.float32).reshape(1, 1, 3, 3)

    def conv(w):
        return jax.lax.conv_general_dilated(
            x, w, window_strides=(1, 1), padding=((1, 1), (1, 1)),
            dimension_numbers=('NCHW', 'OIHW', 'NCHW'))

    g = jnp.abs(conv(wx)) + jnp.abs(conv(wy))
    g = jax.lax.reduce_window(
        g, -jnp.inf, jax.lax.max,
        window_dimensions=(1, 1, 9, 9), window_strides=(1, 1, 1, 1),
        padding=((0, 0), (0, 0), (4, 4), (4, 4)))
    mg = (g > 0.001).astype(jnp.float32)[0, 0]

    on_err = jnp.sum(err_map * mg)
    tot = jnp.sum(err_map)
    on_num = jnp.sum((mg * err_mask > 0).astype(jnp.float32))
    off_num = jnp.sum((err_mask > 0).astype(jnp.float32))
    return jnp.stack([on_err, tot - on_err, on_num, off_num])


# -------------------------------- main -------------------------------------

if __name__ == "__main__":
    key = jax.random.PRNGKey(0)
    k1, k2, k3 = jax.random.split(key, 3)

    H, W = 64, 200
    # piecewise-constant semantic label map (class ids 0..19) so the demo has
    # both on-border and off-border pixels
    blocks = jax.random.randint(k1, (4, 5), 0, 20)
    labels = jnp.repeat(jnp.repeat(blocks, 16, axis=0), 40, axis=1)[:H, :W]
    seman_label = labels.astype(jnp.float32)[None, None]        # (1, 1, H, W)

    err_map = jax.random.uniform(k2, (H, W), dtype=jnp.float32)
    err_mask = (jax.random.uniform(k3, (H, W)) > 0.5).astype(jnp.float32)

    stats = compute_err_on_border(seman_label, err_map, err_mask)
    stats = jax.block_until_ready(stats)

    ref = jax.block_until_ready(_reference(seman_label, err_map, err_mask))
    # f32 sums are re-associated differently in the tiled kernel vs. the lax
    # reference; counts are exact, error sums agree to ~1e-6 relative.
    np.testing.assert_allclose(np.asarray(stats), np.asarray(ref),
                               rtol=1e-4, atol=1e-2)

    # TODO(synk): the running-statistics accumulation (self.onborderErr += ...)
    # is host-side Python state in the original module; the kernel returns the
    # per-call increments instead.
    print("KERNEL_OK")
</pallas_src>

<mosaic_0001>
module attributes {stable_mosaic.version = 11 : i64} {
  func.func @kernel(%arg0: i32, %arg1: i32, %arg2: memref<144x256xf32, #tpu.memory_space<any>>, %arg3: memref<64x256xf32, #tpu.memory_space<vmem>>, %arg4: memref<64x256xi8, #tpu.memory_space<vmem>>, %arg5: memref<32x256xf32, #tpu.memory_space<vmem>>, %arg6: memref<2x80x256xf32, #tpu.memory_space<vmem>>, %arg7: memref<2x!tpu.dma_semaphore, #tpu.memory_space<semaphore_mem>>) attributes {dimension_semantics = [#tpu.dimension_semantics<parallel>, #tpu.dimension_semantics<arbitrary>], iteration_bounds = array<i64: 2, 1>, scalar_prefetch = 0 : i64, scratch_operands = 2 : i64, tpu.core_type = #tpu.core_type<tc>, window_params = [{}, {transform_indices = @transform_1, window_bounds = array<i64: 64, 256>}, {transform_indices = @transform_2, window_bounds = array<i64: 64, 256>}, {transform_indices = @transform_3, window_bounds = array<i64: 32, 256>}]} {
    %c1_i32 = arith.constant 1 : i32
    %0 = arith.muli %arg0, %c1_i32 : i32
    %1 = arith.addi %0, %arg1 : i32
    %c2_i32 = arith.constant 2 : i32
    %2 = arith.remsi %arg1, %c2_i32 : i32
    %c0_i32 = arith.constant 0 : i32
    %3 = arith.cmpi eq, %arg1, %c0_i32 : i32
    %4 = arith.extui %3 : i1 to i32
    %c0_i32_0 = arith.constant 0 : i32
    %5 = arith.cmpi ne, %4, %c0_i32_0 : i32
    scf.if %5 {
      %cst_39 = arith.constant 0.000000e+00 : f32
      %156 = vector.broadcast %cst_39 : f32 to vector<32x256xf32>
      %c0_40 = arith.constant 0 : index
      %c0_41 = arith.constant 0 : index
      %157 = vector.load %arg5[%c0_40, %c0_41] : memref<32x256xf32, #tpu.memory_space<vmem>>, vector<32x256xf32>
      tpu.vector_store %arg5[%c0_40, %c0_41], %156 {strides = array<i32>} : memref<32x256xf32, #tpu.memory_space<vmem>>, vector<32x256xf32>,
      %c64_i32_42 = arith.constant 64 : i32
      %158 = arith.muli %1, %c64_i32_42 : i32
      %159 = tpu.assume_multiple %158, 32 : i32
      %c0_i32_43 = arith.constant 0 : i32
      %160 = tpu.memref_slice %arg2[%159, %c0_i32_43] : memref<144x256xf32, #tpu.memory_space<any>> -> memref<80x256xf32, #tpu.memory_space<any>>
      %c0_i32_44 = arith.constant 0 : i32
      %c0_i32_45 = arith.constant 0 : i32
      %161 = tpu.memref_slice %arg6[%2, %c0_i32_44, %c0_i32_45] : memref<2x80x256xf32, #tpu.memory_space<vmem>> -> memref<1x80x256xf32, #tpu.memory_space<vmem>>
      %162 = tpu.memref_squeeze %161 : memref<1x80x256xf32, #tpu.memory_space<vmem>> -> memref<80x256xf32, #tpu.memory_space<vmem>>
      %163 = tpu.memref_slice %arg7[%2] : memref<2x!tpu.dma_semaphore, #tpu.memory_space<semaphore_mem>> -> memref<1x!tpu.dma_semaphore, #tpu.memory_space<semaphore_mem>>
      %164 = tpu.memref_squeeze %163 : memref<1x!tpu.dma_semaphore, #tpu.memory_space<semaphore_mem>> -> memref<!tpu.dma_semaphore, #tpu.memory_space<semaphore_mem>>
      tpu.enqueue_dma source(%160 : memref<80x256xf32, #tpu.memory_space<any>>) target(%162 : memref<80x256xf32, #tpu.memory_space<vmem>>) target_semaphore(%164 : memref<!tpu.dma_semaphore, #tpu.memory_space<semaphore_mem>>)
    } else {
    }
    %c1_i32_1 = arith.constant 1 : i32
    %6 = arith.addi %arg1, %c1_i32_1 : i32
    %c1_i32_2 = arith.constant 1 : i32
    %7 = arith.cmpi slt, %6, %c1_i32_2 : i32
    %8 = arith.extui %7 : i1 to i32
    %c0_i32_3 = arith.constant 0 : i32
    %9 = arith.cmpi ne, %8, %c0_i32_3 : i32
    scf.if %9 {
      %c1_i32_39 = arith.constant 1 : i32
      %156 = arith.addi %1, %c1_i32_39 : i32
      %c1_i32_40 = arith.constant 1 : i32
      %157 = arith.subi %c1_i32_40, %2 : i32
      %c64_i32_41 = arith.constant 64 : i32
      %158 = arith.muli %156, %c64_i32_41 : i32
      %159 = tpu.assume_multiple %158, 32 : i32
      %c0_i32_42 = arith.constant 0 : i32
      %160 = tpu.memref_slice %arg2[%159, %c0_i32_42] : memref<144x256xf32, #tpu.memory_space<any>> -> memref<80x256xf32, #tpu.memory_space<any>>
      %c0_i32_43 = arith.constant 0 : i32
      %c0_i32_44 = arith.constant 0 : i32
      %161 = tpu.memref_slice %arg6[%157, %c0_i32_43, %c0_i32_44] : memref<2x80x256xf32, #tpu.memory_space<vmem>> -> memref<1x80x256xf32, #tpu.memory_space<vmem>>
      %162 = tpu.memref_squeeze %161 : memref<1x80x256xf32, #tpu.memory_space<vmem>> -> memref<80x256xf32, #tpu.memory_space<vmem>>
      %163 = tpu.memref_slice %arg7[%157] : memref<2x!tpu.dma_semaphore, #tpu.memory_space<semaphore_mem>> -> memref<1x!tpu.dma_semaphore, #tpu.memory_space<semaphore_mem>>
      %164 = tpu.memref_squeeze %163 : memref<1x!tpu.dma_semaphore, #tpu.memory_space<semaphore_mem>> -> memref<!tpu.dma_semaphore, #tpu.memory_space<semaphore_mem>>
      tpu.enqueue_dma source(%160 : memref<80x256xf32, #tpu.memory_space<any>>) target(%162 : memref<80x256xf32, #tpu.memory_space<vmem>>) target_semaphore(%164 : memref<!tpu.dma_semaphore, #tpu.memory_space<semaphore_mem>>)
    } else {
    }
    %c0_i32_4 = arith.constant 0 : i32
    %c0_i32_5 = arith.constant 0 : i32
    %10 = tpu.memref_slice %arg2[%c0_i32_4, %c0_i32_5] : memref<144x256xf32, #tpu.memory_space<any>> -> memref<80x256xf32, #tpu.memory_space<any>>
    %c0_i32_6 = arith.constant 0 : i32
    %c0_i32_7 = arith.constant 0 : i32
    %11 = tpu.memref_slice %arg6[%2, %c0_i32_6, %c0_i32_7] : memref<2x80x256xf32, #tpu.memory_space<vmem>> -> memref<1x80x256xf32, #tpu.memory_space<vmem>>
    %12 = tpu.memref_squeeze %11 : memref<1x80x256xf32, #tpu.memory_space<vmem>> -> memref<80x256xf32, #tpu.memory_space<vmem>>
    %13 = tpu.memref_slice %arg7[%2] : memref<2x!tpu.dma_semaphore, #tpu.memory_space<semaphore_mem>> -> memref<1x!tpu.dma_semaphore, #tpu.memory_space<semaphore_mem>>
    %14 = tpu.memref_squeeze %13 : memref<1x!tpu.dma_semaphore, #tpu.memory_space<semaphore_mem>> -> memref<!tpu.dma_semaphore, #tpu.memory_space<semaphore_mem>>
    tpu.wait_dma2 semaphore(%14 : memref<!tpu.dma_semaphore, #tpu.memory_space<semaphore_mem>>) src(%10 : memref<80x256xf32, #tpu.memory_space<any>>) dst(%12 : memref<80x256xf32, #tpu.memory_space<vmem>>)
    %15 = arith.index_cast %2 : i32 to index
    %c0 = arith.constant 0 : index
    %c0_8 = arith.constant 0 : index
    %16 = vector.load %arg6[%15, %c0, %c0_8] : memref<2x80x256xf32, #tpu.memory_space<vmem>>, vector<1x80x256xf32>
    %17 = vector.shape_cast %16 : vector<1x80x256xf32> to vector<80x256xf32>
    %c1_i32_9 = arith.constant 1 : i32
    %18 = tpu.dynamic_rotate %17 by %c1_i32_9 dim 0 : vector<80x256xf32>, i32 -> vector<80x256xf32>
    %c79_i32 = arith.constant 79 : i32
    %19 = tpu.dynamic_rotate %17 by %c79_i32 dim 0 : vector<80x256xf32>, i32 -> vector<80x256xf32>
    %cst = arith.constant 2.000000e+00 : f32
    %20 = vector.broadcast %cst : f32 to vector<80x256xf32>
    %21 = arith.mulf %20, %17 : vector<80x256xf32>
    %22 = arith.addf %18, %21 : vector<80x256xf32>
    %23 = arith.addf %22, %19 : vector<80x256xf32>
    %24 = arith.subf %18, %19 : vector<80x256xf32>
    %c255_i32 = arith.constant 255 : i32
    %25 = tpu.dynamic_rotate %23 by %c255_i32 dim 1 : vector<80x256xf32>, i32 -> vector<80x256xf32>
    %c1_i32_10 = arith.constant 1 : i32
    %26 = tpu.dynamic_rotate %23 by %c1_i32_10 dim 1 : vector<80x256xf32>, i32 -> vector<80x256xf32>
    %27 = arith.subf %25, %26 : vector<80x256xf32>
    %c1_i32_11 = arith.constant 1 : i32
    %28 = tpu.dynamic_rotate %24 by %c1_i32_11 dim 1 : vector<80x256xf32>, i32 -> vector<80x256xf32>
    %cst_12 = arith.constant 2.000000e+00 : f32
    %29 = vector.broadcast %cst_12 : f32 to vector<80x256xf32>
    %30 = arith.mulf %29, %24 : vector<80x256xf32>
    %31 = arith.addf %28, %30 : vector<80x256xf32>
    %c255_i32_13 = arith.constant 255 : i32
    %32 = tpu.dynamic_rotate %24 by %c255_i32_13 dim 1 : vector<80x256xf32>, i32 -> vector<80x256xf32>
    %33 = arith.addf %31, %32 : vector<80x256xf32>
    %34 = math.absf %27 : vector<80x256xf32>
    %35 = math.absf %33 : vector<80x256xf32>
    %36 = arith.addf %34, %35 : vector<80x256xf32>
    %37 = tpu.iota {dimensions = array<i32: 0>} : vector<80x1xi32>
    %c64_i32 = arith.constant 64 : i32
    %38 = arith.muli %1, %c64_i32 : i32
    %c8_i32 = arith.constant 8 : i32
    %39 = arith.subi %38, %c8_i32 : i32
    %40 = vector.broadcast %39 : i32 to vector<80x1xi32>
    %41 = arith.addi %37, %40 : vector<80x1xi32>
    %c0_i32_14 = arith.constant 0 : i32
    %42 = vector.broadcast %c0_i32_14 : i32 to vector<80x1xi32>
    %43 = arith.cmpi sge, %41, %42 : vector<80x1xi32>
    %c64_i32_15 = arith.constant 64 : i32
    %44 = vector.broadcast %c64_i32_15 : i32 to vector<80x1xi32>
    %45 = arith.cmpi slt, %41, %44 : vector<80x1xi32>
    %46 = arith.andi %43, %45 : vector<80x1xi1>
    %47 = arith.extui %46 : vector<80x1xi1> to vector<80x1xi32>
    %48 = arith.sitofp %47 : vector<80x1xi32> to vector<80x1xf32>
    %49 = tpu.iota {dimensions = array<i32: 1>} : vector<1x256xi32>
    %c200_i32 = arith.constant 200 : i32
    %50 = vector.broadcast %c200_i32 : i32 to vector<1x256xi32>
    %51 = arith.cmpi slt, %49, %50 : vector<1x256xi32>
    %52 = arith.extui %51 : vector<1x256xi1> to vector<1x256xi32>
    %53 = arith.sitofp %52 : vector<1x256xi32> to vector<1x256xf32>
    %54 = vector.broadcast %48 : vector<80x1xf32> to vector<80x256xf32>
    %55 = arith.mulf %36, %54 : vector<80x256xf32>
    %56 = vector.broadcast %53 : vector<1x256xf32> to vector<80x256xf32>
    %57 = arith.mulf %55, %56 : vector<80x256xf32>
    %c1_i32_16 = arith.constant 1 : i32
    %58 = tpu.dynamic_rotate %57 by %c1_i32_16 dim 0 : vector<80x256xf32>, i32 -> vector<80x256xf32>
    %c79_i32_17 = arith.constant 79 : i32
    %59 = tpu.dynamic_rotate %57 by %c79_i32_17 dim 0 : vector<80x256xf32>, i32 -> vector<80x256xf32>
    %60 = arith.maximumf %58, %59 : vector<80x256xf32>
    %61 = arith.maximumf %57, %60 : vector<80x256xf32>
    %c3_i32 = arith.constant 3 : i32
    %62 = tpu.dynamic_rotate %61 by %c3_i32 dim 0 : vector<80x256xf32>, i32 -> vector<80x256xf32>
    %c77_i32 = arith.constant 77 : i32
    %63 = tpu.dynamic_rotate %61 by %c77_i32 dim 0 : vector<80x256xf32>, i32 -> vector<80x256xf32>
    %64 = arith.maximumf %62, %63 : vector<80x256xf32>
    %65 = arith.maximumf %61, %64 : vector<80x256xf32>
    %c1_i32_18 = arith.constant 1 : i32
    %66 = tpu.dynamic_rotate %65 by %c1_i32_18 dim 1 : vector<80x256xf32>, i32 -> vector<80x256xf32>
    %c255_i32_19 = arith.constant 255 : i32
    %67 = tpu.dynamic_rotate %65 by %c255_i32_19 dim 1 : vector<80x256xf32>, i32 -> vector<80x256xf32>
    %68 = arith.maximumf %66, %67 : vector<80x256xf32>
    %69 = arith.maximumf %65, %68 : vector<80x256xf32>
    %c3_i32_20 = arith.constant 3 : i32
    %70 = tpu.dynamic_rotate %69 by %c3_i32_20 dim 1 : vector<80x256xf32>, i32 -> vector<80x256xf32>
    %c253_i32 = arith.constant 253 : i32
    %71 = tpu.dynamic_rotate %69 by %c253_i32 dim 1 : vector<80x256xf32>, i32 -> vector<80x256xf32>
    %72 = arith.maximumf %70, %71 : vector<80x256xf32>
    %73 = arith.maximumf %69, %72 : vector<80x256xf32>
    %74 = vector.extract_strided_slice %73 {offsets = [8, 0], sizes = [64, 256], strides = [1, 1]} : vector<80x256xf32> to vector<64x256xf32>
    %cst_21 = arith.constant 1.000000e-03 : f32
    %75 = vector.broadcast %cst_21 : f32 to vector<64x256xf32>
    %76 = arith.cmpf ogt, %74, %75 : vector<64x256xf32>
    %77 = arith.extui %76 : vector<64x256xi1> to vector<64x256xi32>
    %78 = arith.sitofp %77 : vector<64x256xi32> to vector<64x256xf32>
    %c0_22 = arith.constant 0 : index
    %c0_23 = arith.constant 0 : index
    %79 = vector.load %arg3[%c0_22, %c0_23] : memref<64x256xf32, #tpu.memory_space<vmem>>, vector<64x256xf32>
    %c0_24 = arith.constant 0 : index
    %c0_25 = arith.constant 0 : index
    %80 = vector.load %arg4[%c0_24, %c0_25] : memref<64x256xi8, #tpu.memory_space<vmem>>, vector<64x256xi8>
    %81 = arith.uitofp %80 : vector<64x256xi8> to vector<64x256xf32>
    %c0_26 = arith.constant 0 : index
    %c0_27 = arith.constant 0 : index
    %82 = vector.load %arg5[%c0_26, %c0_27] : memref<32x256xf32, #tpu.memory_space<vmem>>, vector<8x256xf32>
    %83 = arith.mulf %79, %78 : vector<64x256xf32>
    %84 = vector.extract_strided_slice %83 {offsets = [0, 0], sizes = [8, 256], strides = [1, 1]} : vector<64x256xf32> to vector<8x256xf32>
    %85 = vector.extract_strided_slice %83 {offsets = [8, 0], sizes = [8, 256], strides = [1, 1]} : vector<64x256xf32> to vector<8x256xf32>
    %86 = arith.addf %84, %85 : vector<8x256xf32>
    %87 = vector.extract_strided_slice %83 {offsets = [16, 0], sizes = [8, 256], strides = [1, 1]} : vector<64x256xf32> to vector<8x256xf32>
    %88 = arith.addf %86, %87 : vector<8x256xf32>
    %89 = vector.extract_strided_slice %83 {offsets = [24, 0], sizes = [8, 256], strides = [1, 1]} : vector<64x256xf32> to vector<8x256xf32>
    %90 = arith.addf %88, %89 : vector<8x256xf32>
    %91 = vector.extract_strided_slice %83 {offsets = [32, 0], sizes = [8, 256], strides = [1, 1]} : vector<64x256xf32> to vector<8x256xf32>
    %92 = arith.addf %90, %91 : vector<8x256xf32>
    %93 = vector.extract_strided_slice %83 {offsets = [40, 0], sizes = [8, 256], strides = [1, 1]} : vector<64x256xf32> to vector<8x256xf32>
    %94 = arith.addf %92, %93 : vector<8x256xf32>
    %95 = vector.extract_strided_slice %83 {offsets = [48, 0], sizes = [8, 256], strides = [1, 1]} : vector<64x256xf32> to vector<8x256xf32>
    %96 = arith.addf %94, %95 : vector<8x256xf32>
    %97 = vector.extract_strided_slice %83 {offsets = [56, 0], sizes = [8, 256], strides = [1, 1]} : vector<64x256xf32> to vector<8x256xf32>
    %98 = arith.addf %96, %97 : vector<8x256xf32>
    %99 = arith.addf %82, %98 : vector<8x256xf32>
    %c0_28 = arith.constant 0 : index
    %c0_29 = arith.constant 0 : index
    %100 = vector.load %arg5[%c0_28, %c0_29] : memref<32x256xf32, #tpu.memory_space<vmem>>, vector<8x256xf32>
    tpu.vector_store %arg5[%c0_28, %c0_29], %99 {strides = array<i32>} : memref<32x256xf32, #tpu.memory_space<vmem>>, vector<8x256xf32>,
    %c8 = arith.constant 8 : index
    %c0_30 = arith.constant 0 : index
    %101 = vector.load %arg5[%c8, %c0_30] : memref<32x256xf32, #tpu.memory_space<vmem>>, vector<8x256xf32>
    %102 = vector.extract_strided_slice %79 {offsets = [0, 0], sizes = [8, 256], strides = [1, 1]} : vector<64x256xf32> to vector<8x256xf32>
    %103 = vector.extract_strided_slice %79 {offsets = [8, 0], sizes = [8, 256], strides = [1, 1]} : vector<64x256xf32> to vector<8x256xf32>
    %104 = arith.addf %102, %103 : vector<8x256xf32>
    %105 = vector.extract_strided_slice %79 {offsets = [16, 0], sizes = [8, 256], strides = [1, 1]} : vector<64x256xf32> to vector<8x256xf32>
    %106 = arith.addf %104, %105 : vector<8x256xf32>
    %107 = vector.extract_strided_slice %79 {offsets = [24, 0], sizes = [8, 256], strides = [1, 1]} : vector<64x256xf32> to vector<8x256xf32>
    %108 = arith.addf %106, %107 : vector<8x256xf32>
    %109 = vector.extract_strided_slice %79 {offsets = [32, 0], sizes = [8, 256], strides = [1, 1]} : vector<64x256xf32> to vector<8x256xf32>
    %110 = arith.addf %108, %109 : vector<8x256xf32>
    %111 = vector.extract_strided_slice %79 {offsets = [40, 0], sizes = [8, 256], strides = [1, 1]} : vector<64x256xf32> to vector<8x256xf32>
    %112 = arith.addf %110, %111 : vector<8x256xf32>
    %113 = vector.extract_strided_slice %79 {offsets = [48, 0], sizes = [8, 256], strides = [1, 1]} : vector<64x256xf32> to vector<8x256xf32>
    %114 = arith.addf %112, %113 : vector<8x256xf32>
    %115 = vector.extract_strided_slice %79 {offsets = [56, 0], sizes = [8, 256], strides = [1, 1]} : vector<64x256xf32> to vector<8x256xf32>
    %116 = arith.addf %114, %115 : vector<8x256xf32>
    %117 = arith.addf %101, %116 : vector<8x256xf32>
    %c8_31 = arith.constant 8 : index
    %c0_32 = arith.constant 0 : index
    %118 = vector.load %arg5[%c8_31, %c0_32] : memref<32x256xf32, #tpu.memory_space<vmem>>, vector<8x256xf32>
    tpu.vector_store %arg5[%c8_31, %c0_32], %117 {strides = array<i32>} : memref<32x256xf32, #tpu.memory_space<vmem>>, vector<8x256xf32>,
    %c16 = arith.constant 16 : index
    %c0_33 = arith.constant 0 : index
    %119 = vector.load %arg5[%c16, %c0_33] : memref<32x256xf32, #tpu.memory_space<vmem>>, vector<8x256xf32>
    %120 = arith.mulf %78, %81 : vector<64x256xf32>
    %121 = vector.extract_strided_slice %120 {offsets = [0, 0], sizes = [8, 256], strides = [1, 1]} : vector<64x256xf32> to vector<8x256xf32>
    %122 = vector.extract_strided_slice %120 {offsets = [8, 0], sizes = [8, 256], strides = [1, 1]} : vector<64x256xf32> to vector<8x256xf32>
    %123 = arith.addf %121, %122 : vector<8x256xf32>
    %124 = vector.extract_strided_slice %120 {offsets = [16, 0], sizes = [8, 256], strides = [1, 1]} : vector<64x256xf32> to vector<8x256xf32>
    %125 = arith.addf %123, %124 : vector<8x256xf32>
    %126 = vector.extract_strided_slice %120 {offsets = [24, 0], sizes = [8, 256], strides = [1, 1]} : vector<64x256xf32> to vector<8x256xf32>
    %127 = arith.addf %125, %126 : vector<8x256xf32>
    %128 = vector.extract_strided_slice %120 {offsets = [32, 0], sizes = [8, 256], strides = [1, 1]} : vector<64x256xf32> to vector<8x256xf32>
    %129 = arith.addf %127, %128 : vector<8x256xf32>
    %130 = vector.extract_strided_slice %120 {offsets = [40, 0], sizes = [8, 256], strides = [1, 1]} : vector<64x256xf32> to vector<8x256xf32>
    %131 = arith.addf %129, %130 : vector<8x256xf32>
    %132 = vector.extract_strided_slice %120 {offsets = [48, 0], sizes = [8, 256], strides = [1, 1]} : vector<64x256xf32> to vector<8x256xf32>
    %133 = arith.addf %131, %132 : vector<8x256xf32>
    %134 = vector.extract_strided_slice %120 {offsets = [56, 0], sizes = [8, 256], strides = [1, 1]} : vector<64x256xf32> to vector<8x256xf32>
    %135 = arith.addf %133, %134 : vector<8x256xf32>
    %136 = arith.addf %119, %135 : vector<8x256xf32>
    %c16_34 = arith.constant 16 : index
    %c0_35 = arith.constant 0 : index
    %137 = vector.load %arg5[%c16_34, %c0_35] : memref<32x256xf32, #tpu.memory_space<vmem>>, vector<8x256xf32>
    tpu.vector_store %arg5[%c16_34, %c0_35], %136 {strides = array<i32>} : memref<32x256xf32, #tpu.memory_space<vmem>>, vector<8x256xf32>,
    %c24 = arith.constant 24 : index
    %c0_36 = arith.constant 0 : index
    %138 = vector.load %arg5[%c24, %c0_36] : memref<32x256xf32, #tpu.memory_space<vmem>>, vector<8x256xf32>
    %139 = vector.extract_strided_slice %81 {offsets = [0, 0], sizes = [8, 256], strides = [1, 1]} : vector<64x256xf32> to vector<8x256xf32>
    %140 = vector.extract_strided_slice %81 {offsets = [8, 0], sizes = [8, 256], strides = [1, 1]} : vector<64x256xf32> to vector<8x256xf32>
    %141 = arith.addf %139, %140 : vector<8x256xf32>
    %142 = vector.extract_strided_slice %81 {offsets = [16, 0], sizes = [8, 256], strides = [1, 1]} : vector<64x256xf32> to vector<8x256xf32>
    %143 = arith.addf %141, %142 : vector<8x256xf32>
    %144 = vector.extract_strided_slice %81 {offsets = [24, 0], sizes = [8, 256], strides = [1, 1]} : vector<64x256xf32> to vector<8x256xf32>
    %145 = arith.addf %143, %144 : vector<8x256xf32>
    %146 = vector.extract_strided_slice %81 {offsets = [32, 0], sizes = [8, 256], strides = [1, 1]} : vector<64x256xf32> to vector<8x256xf32>
    %147 = arith.addf %145, %146 : vector<8x256xf32>
    %148 = vector.extract_strided_slice %81 {offsets = [40, 0], sizes = [8, 256], strides = [1, 1]} : vector<64x256xf32> to vector<8x256xf32>
    %149 = arith.addf %147, %148 : vector<8x256xf32>
    %150 = vector.extract_strided_slice %81 {offsets = [48, 0], sizes = [8, 256], strides = [1, 1]} : vector<64x256xf32> to vector<8x256xf32>
    %151 = arith.addf %149, %150 : vector<8x256xf32>
    %152 = vector.extract_strided_slice %81 {offsets = [56, 0], sizes = [8, 256], strides = [1, 1]} : vector<64x256xf32> to vector<8x256xf32>
    %153 = arith.addf %151, %152 : vector<8x256xf32>
    %154 = arith.addf %138, %153 : vector<8x256xf32>
    %c24_37 = arith.constant 24 : index
    %c0_38 = arith.constant 0 : index
    %155 = vector.load %arg5[%c24_37, %c0_38] : memref<32x256xf32, #tpu.memory_space<vmem>>, vector<8x256xf32>
    tpu.vector_store %arg5[%c24_37, %c0_38], %154 {strides = array<i32>} : memref<32x256xf32, #tpu.memory_space<vmem>>, vector<8x256xf32>,
    return
  }
  func.func @transform_1(%arg0: i32, %arg1: i32) -> (i32, i32) {
    %c1_i32 = arith.constant 1 : i32
    %0 = arith.muli %arg0, %c1_i32 : i32
    %1 = arith.addi %0, %arg1 : i32
    %c0_i32 = arith.constant 0 : i32
    %c0_i32_0 = arith.constant 0 : i32
    return %1, %c0_i32 : i32, i32
  }
  func.func @transform_2(%arg0: i32, %arg1: i32) -> (i32, i32) {
    %c1_i32 = arith.constant 1 : i32
    %0 = arith.muli %arg0, %c1_i32 : i32
    %1 = arith.addi %0, %arg1 : i32
    %c0_i32 = arith.constant 0 : i32
    %c0_i32_0 = arith.constant 0 : i32
    return %1, %c0_i32 : i32, i32
  }
  func.func @transform_3(%arg0: i32, %arg1: i32) -> (i32, i32) {
    %c0_i32 = arith.constant 0 : i32
    %c0_i32_0 = arith.constant 0 : i32
    return %arg0, %c0_i32 : i32, i32
  }
}

</mosaic_0001>

<bundles_post_ra>
// kernel: compute_err_on_border.1
= control target key start
LH: loop header
LB: loop body
LE: loop exit
PB: predicated region body
PF: predicated region fallthrough
CT: control target
= control target key end

     0   :  { %s2095_s12 = smov 0   ;;  %s2097_s13 = smov 0   ;;  %s4350_s0 = inlined_call_operand.vmem [shape: f32[144,256], index: 0, kind: input, shape index: {}]   ;;  %s4351_s1 = inlined_call_operand.vmem [shape: f32[128,256], index: 1, kind: input, shape index: {}]   ;;  %s4352_s2 = inlined_call_operand.vmem [shape: u8[128,256], index: 2, kind: input, shape index: {}]   ;;  %s4353_s3 = inlined_call_operand.vmem [shape: f32[64,256], index: 3, kind: output, shape index: {}]  }
   0x1   :  { %s2099_s14 = smov 0  }
   0x2 LB: > { %s25_s15 = sadd.s32 1, %s2064_s13  ;;  %p1938_p0 = scmp.ge.s32.totalorder %s2068_s14, 1  ;;  %s2068_s14 = sphi %s2099_s14, %s13_s14   ;;  %s2064_s13 = sphi %s2097_s13, %s4536_s13   ;;  %s2060_s12 = sphi %s2095_s12, %s4535_s12  }
   0x3   : > { %p27_p1 = scmp.ge.s32.totalorder %s25_s15, 2  ;;  %p147_p2 = scmp.lt.s32.totalorder %s2068_s14, 3 }
   0x5   : > { %s4538_s15 = smov (%p27_p1, %s25_s15), 0  ;;  %p148_p3 = pnand %p1938_p0, %p147_p2 }
   0x7   : > { %151 = sbr.rel (%p148_p3) target bundleno = 643 (0x283), region = 28 }
   0xe   : > { %s1939_s16 = sshll.u32 %s2060_s12, 3  ;;  %s1942_s17 = sshll.u32 %s2060_s12, 1  ;;  %v4354_v3 = vmov 0.0  }
   0xf   : > { %p181_p4 = scmp.lt.s32.totalorder %s1939_s16, 15  ;;  %p190_p5 = scmp.lt.s32.totalorder %s1942_s17, 3 }
  0x10   : > { %s1945_s18 = sshll.u32 %s2060_s12, 2  ;;  %s1948_s19 = sshll.u32 %s2060_s12, 6 }
  0x11   : > { %s4540_s16 = smov (!%p181_p4, %s1939_s16), 15  ;;  %s4542_s17 = smov (!%p190_p5, %s1942_s17), 3 }
  0x12   : > { %s2008_s20 = sshll.u32 %s4540_s16, 4  ;;  %p198_p6 = scmp.lt.s32.totalorder %s1945_s18, 7 }
  0x13   : > { %s2122_s23 = scalar_lea.vmem %s4351_s1, %s2008_s20  ;;  %s2009_s24 = sshll.u32 %s4542_s17, 4 }
  0x14   : > { %s2127_s27 = scalar_lea.vmem %s4352_s2, %s2009_s24  ;;  %s224_s28 = sshra.s32 %s1948_s19, 3 }
  0x15   : > { %s4544_s18 = smov (!%p198_p6, %s1945_s18), 7  ;;  %s2011_s29 = sshll.u32 %s224_s28, 4 }
  0x16   : > { %s2010_s30 = sshll.u32 %s4544_s18, 4  ;;  %s228_s6 = scalar_lea.vmem %s4350_s0, %s2011_s29 }
  0x17   : > { %s2137_s9 = scalar_lea.vmem %s4353_s3, %s2010_s30  ;;  %v2139_v0 = vld [vmem:[%s228_s6] sm:$0xff]  ;;  %v2141_v1 = vld [vmem:[%s228_s6 + $0x8] sm:$0xff]  ;;  %v269_v2 = vld [vmem:[%s228_s6 + $0x10] sm:$0xff] }
  0x18   : > { %215 = vst [vmem:[%s2137_s9] sm:$0xff] %v4354_v3  ;;  %216 = vst [vmem:[%s2137_s9 + $0x8] sm:$0xff] %v4354_v3  ;;  %v2147_v4 = vld [vmem:[%s228_s6 + $0x18] sm:$0xff]  ;;  %v273_v5 = vld [vmem:[%s228_s6 + $0x20] sm:$0xff] }
  0x19   : > { %v2149_v6 = vld [vmem:[%s228_s6 + $0x28] sm:$0xff]  ;;  %217 = vst [vmem:[%s2137_s9 + $0x10] sm:$0xff] %v4354_v3  ;;  %v2153_v7 = vld [vmem:[%s228_s6 + $0x30] sm:$0xff]  ;;  %v2155_v8 = vld [vmem:[%s228_s6 + $0x38] sm:$0xff] }
  0x1a   : > { %v2157_v9 = vld [vmem:[%s228_s6 + $0x40] sm:$0xff]  ;;  %218 = vst [vmem:[%s2137_s9 + $0x18] sm:$0xff] %v4354_v3  ;;  %v2161_v10 = vld [vmem:[%s228_s6 + $0x48] sm:$0xff]  ;;  %v2163_v11 = vld [vmem:[%s228_s6 + $0x50] sm:$0xff] }
  0x1b   : > { %v2165_v12 = vld [vmem:[%s228_s6 + $0x58] sm:$0xff]  ;;  %219 = vst [vmem:[%s2137_s9 + $0x20] sm:$0xff] %v4354_v3  ;;  %220 = vst [vmem:[%s2137_s9 + $0x28] sm:$0xff] %v4354_v3  ;;  %v2171_v13 = vld [vmem:[%s228_s6 + $0x60] sm:$0xff] }
  0x1c   : > { %v2173_v14 = vld [vmem:[%s228_s6 + $0x68] sm:$0xff]  ;;  %v2175_v15 = vld [vmem:[%s228_s6 + $0x70] sm:$0xff]  ;;  %221 = vst [vmem:[%s2137_s9 + $0x30] sm:$0xff] %v4354_v3  ;;  %222 = vst [vmem:[%s2137_s9 + $0x38] sm:$0xff] %v4354_v3 }
  0x1d   : > { %v2181_v16 = vld [vmem:[%s228_s6 + $0x78] sm:$0xff]  ;;  %v2183_v17 = vld [vmem:[%s228_s6 + $0x80] sm:$0xff]  ;;  %v2185_v18 = vld [vmem:[%s228_s6 + $0x88] sm:$0xff] }
  0x1e   : > { %v2187_v19 = vld [vmem:[%s228_s6 + $0x90] sm:$0xff]  ;;  %v2189_v20 = vld [vmem:[%s228_s6 + $0x98] sm:$0xff] }
  0x1f   : > { %312 = vsyncadd [#allocation3], 2560  ;;  %v440_v21 = vrot.slane %v269_v2, 7  ;;  %v442_v22 = vrot.slane %v273_v5, 7  ;;  %v458_v23 = vlaneseq  ;;  %v485_v24 = vrot.slane %v273_v5, 1 }
  0x20   : > { %v487_v25 = vrot.slane %v2153_v7, 1  ;;  %v526_v26 = vmul.f32 2.0, %v273_v5  ;;  %v438_v27 = vrot.slane %v2139_v0, 7  ;;  %v456_v28 = vrot.slane %v2187_v19, 7 }
  0x21   : > { %2056 = dma.done.wait [#allocation3], 2560 }
  0x22   : > { %2057 = vsyncadd [#allocation3], 4294964736  ;;  %v2195_v29 = vshrl.u32 %v458_v23, 7  ;;  %v481_v30 = vrot.slane %v2139_v0, 1  ;;  %v483_v31 = vrot.slane %v269_v2, 1  ;;  %v522_v32 = vmul.f32 2.0, %v2139_v0 }
  0x23   : > { %v444_v33 = vrot.slane %v2153_v7, 7  ;;  %v489_v34 = vrot.slane %v2157_v9, 1  ;;  %v528_v35 = vmul.f32 2.0, %v2153_v7  ;;  %v524_v36 = vmul.f32 2.0, %v269_v2  ;;  %s2071_s10 = smov 127   ;;  %s2072_s11 = smov 1  }
  0x24   : > { %vm4365_vm0 = vcmp.lt.s32.totalorder %v2195_v29, 1  ;;  %vm4363_vm1 = vcmp.lt.s32.totalorder %v2195_v29, 7  ;;  %v446_v37 = vrot.slane %v2157_v9, 7  ;;  %v448_v38 = vrot.slane %v2163_v11, 7  ;;  %s1976_s16 = sadd.s32 4294967288, %s1948_s19  ;;  %s2073_s12 = smov 3  }
  0x25   : > { %v2208_v39 = vsel %vm4365_vm0, %v440_v21, %v442_v22  ;;  %v2212_v40 = vsel %vm4363_vm1, %v485_v24, %v487_v25  ;;  %v2218_v41 = vsel %vm4365_vm0, %v456_v28, %v438_v27  ;;  %v2224_v42 = vsel %vm4363_vm1, %v481_v30, %v483_v31  ;;  %s2074_s17 = smov 125  }
  0x26   : > { %v546_v43 = vadd.f32 %v526_v26, %v2208_v39  ;;  %v542_v44 = vadd.f32 %v522_v32, %v2218_v41  ;;  %v2230_v45 = vsel %vm4365_vm0, %v442_v22, %v444_v33  ;;  %v2234_v46 = vsel %vm4363_vm1, %v487_v25, %v489_v34 }
  0x27   : > { %v2238_v47 = vsel %vm4365_vm0, %v438_v27, %v440_v21  ;;  %v2242_v48 = vsel %vm4363_vm1, %v483_v31, %v485_v24  ;;  %v548_v51 = vadd.f32 %v528_v35, %v2230_v45  ;;  %v2254_v53 = vsel %vm4365_vm0, %v446_v37, %v448_v38 }
  0x28   : > { %v2245_v49 = vadd.f32 %v546_v43, %v2212_v40  ;;  %v2248_v50 = vadd.f32 %v542_v44, %v2224_v42  ;;  %v544_v52 = vadd.f32 %v524_v36, %v2238_v47  ;;  %v491_v54 = vrot.slane %v2163_v11, 1 }
  0x29   : > { %v493_v55 = vrot.slane %v2171_v13, 1  ;;  %v532_v56 = vmul.f32 2.0, %v2163_v11  ;;  %v2264_v57 = vadd.f32 %v548_v51, %v2234_v46  ;;  %v2271_v59 = vsel %vm4365_vm0, %v444_v33, %v446_v37 }
  0x2a   : > { %606 = vrot.lane.b32.xlu1 %v2245_v49, %s2071_s10  ;;  %602 = vrot.lane.b32.xlu0 %v2248_v50, %s2071_s10  ;;  %v2267_v58 = vadd.f32 %v544_v52, %v2242_v48  ;;  %v530_v60 = vmul.f32 2.0, %v2157_v9  ;;  %v2281_v63 = vsel %vm4363_vm1, %v489_v34, %v491_v54  ;;  %v450_v2 = vrot.slane %v2171_v13, 7 }
  0x2b   : > { %v2276_v61 = vsel %vm4363_vm1, %v491_v54, %v493_v55  ;;  %v552_v62 = vadd.f32 %v532_v56, %v2254_v53  ;;  %v452_v7 = vrot.slane %v2175_v15, 7  ;;  %v495_v11 = vrot.slane %v2175_v15, 1 }
  0x2c   : > { %v550_v5 = vadd.f32 %v530_v60, %v2271_v59  ;;  %v497_v9 = vrot.slane %v2183_v17, 1  ;;  %v536_v22 = vmul.f32 2.0, %v2175_v15  ;;  %v2294_v24 = vsel %vm4365_vm0, %v448_v38, %v450_v2 }
  0x2d   : > { %v2289_v21 = vadd.f32 %v552_v62, %v2276_v61  ;;  %v534_v25 = vmul.f32 2.0, %v2171_v13  ;;  %v2306_v27 = vsel %vm4365_vm0, %v450_v2, %v452_v7  ;;  %v454_v31 = vrot.slane %v2183_v17, 7 }
  0x2e   : > { %608 = vrot.lane.b32.xlu1 %v2264_v57, %s2071_s10  ;;  %604 = vrot.lane.b32.xlu0 %v2267_v58, %s2071_s10  ;;  %v2302_v26 = vadd.f32 %v550_v5, %v2281_v63  ;;  %v504_v15 = vsel %vm4363_vm1, %v495_v11, %v497_v9  ;;  %v556_v13 = vadd.f32 %v536_v22, %v2306_v27  ;;  %v499_v34 = vrot.slane %v2187_v19, 1 }
  0x2f   : > { %v506_v32 = vsel %vm4363_vm1, %v493_v55, %v495_v11  ;;  %v554_v33 = vadd.f32 %v534_v25, %v2294_v24  ;;  %v2320_v35 = vsel %vm4365_vm0, %v454_v31, %v456_v28  ;;  %v540_v36 = vmul.f32 2.0, %v2187_v19 }
  0x30   : > { %v2325_v37 = vsel %vm4365_vm0, %v452_v7, %v454_v31  ;;  %v538_v38 = vmul.f32 2.0, %v2183_v17  ;;  %v2328_v43 = vadd.f32 %v556_v13, %v504_v15  ;;  %v2336_v51 = vsel %vm4363_vm1, %v499_v34, %v481_v30 }
  0x31   : > { %v2330_v44 = vadd.f32 %v554_v33, %v506_v32  ;;  %v502_v28 = vsel %vm4363_vm1, %v497_v9, %v499_v34  ;;  %v560_v17 = vadd.f32 %v540_v36, %v2320_v35  ;;  %v439_v52 = vrot.slane %v2141_v1, 7 }
  0x32   : > { %612 = vrot.lane.b32.xlu1 %v2289_v21, %s2071_s10  ;;  %610 = vrot.lane.b32.xlu0 %v2302_v26, %s2071_s10  ;;  %v558_v19 = vadd.f32 %v538_v38, %v2325_v37  ;;  %v441_v0 = vrot.slane %v2147_v4, 7  ;;  %v484_v30 = vrot.slane %v2147_v4, 1  ;;  %v486_v54 = vrot.slane %v2149_v6, 1 }
  0x33   : > { %v525_v55 = vmul.f32 2.0, %v2147_v4  ;;  %v457_v56 = vrot.slane %v2189_v20, 7  ;;  %v2353_v60 = vadd.f32 %v560_v17, %v2336_v51  ;;  %v482_v2 = vrot.slane %v2141_v1, 1 }
  0x34   : > { %v478_v62 = vsel %vm4365_vm0, %v439_v52, %v441_v0  ;;  %v2358_v5 = vadd.f32 %v558_v19, %v502_v28  ;;  %v523_v4 = vmul.f32 2.0, %v2141_v1  ;;  %v517_v9 = vsel %vm4363_vm1, %v484_v30, %v486_v54 }
  0x35   : > { %v545_v7 = vadd.f32 %v525_v55, %v478_v62  ;;  %v480_v11 = vsel %vm4365_vm0, %v457_v56, %v439_v52  ;;  %v519_v22 = vsel %vm4363_vm1, %v482_v2, %v484_v30  ;;  %v443_v25 = vrot.slane %v2149_v6, 7 }
  0x36   : > { %616 = vrot.lane.b32.xlu1 %v2328_v43, %s2071_s10  ;;  %614 = vrot.lane.b32.xlu0 %v2330_v44, %s2071_s10  ;;  %v445_v31 = vrot.slane %v2155_v8, 7  ;;  %v543_v13 = vadd.f32 %v523_v4, %v480_v11  ;;  %v488_v33 = vrot.slane %v2155_v8, 1  ;;  %v490_v34 = vrot.slane %v2161_v10, 1 }
  0x37   : > { %v529_v36 = vmul.f32 2.0, %v2155_v8  ;;  %v476_v17 = vsel %vm4365_vm0, %v441_v0, %v443_v25  ;;  %v527_v19 = vmul.f32 2.0, %v2149_v6  ;;  %v2385_v52 = vadd.f32 %v545_v7, %v517_v9 }
  0x38   : > { %v474_v38 = vsel %vm4365_vm0, %v443_v25, %v445_v31  ;;  %v2391_v30 = vadd.f32 %v543_v13, %v519_v22  ;;  %v513_v4 = vsel %vm4363_vm1, %v488_v33, %v490_v34  ;;  %v515_v0 = vsel %vm4363_vm1, %v486_v54, %v488_v33 }
  0x39   : > { %v549_v55 = vadd.f32 %v529_v36, %v474_v38  ;;  %v547_v8 = vadd.f32 %v527_v19, %v476_v17  ;;  %v2407_v25 = vsub.f32 %v2254_v53, %v2276_v61  ;;  %v2410_v13 = vsub.f32 %v2294_v24, %v506_v32 }
  0x3a   : > { %620 = vrot.lane.b32.xlu1 %v2353_v60, %s2071_s10  ;;  %618 = vrot.lane.b32.xlu0 %v2358_v5, %s2071_s10  ;;  %v2414_v54 = vsub.f32 %v2218_v41, %v2224_v42  ;;  %v2422_v33 = vsub.f32 %v2238_v47, %v2242_v48  ;;  %v2425_v53 = vsub.f32 %v2306_v27, %v504_v15  ;;  %v455_v61 = vrot.slane %v2185_v18, 7 }
  0x3b   : > { %v2401_v6 = vadd.f32 %v549_v55, %v513_v4  ;;  %v2403_v7 = vadd.f32 %v547_v8, %v515_v0  ;;  %v500_v24 = vrot.slane %v2189_v20, 1  ;;  %v453_v41 = vrot.slane %v2181_v16, 7 }
  0x3c   : > { %v498_v42 = vrot.slane %v2185_v18, 1  ;;  %v2433_v32 = vsub.f32 %v2208_v39, %v2212_v40  ;;  %v2441_v47 = vsub.f32 %v2230_v45, %v2234_v46  ;;  %v2444_v48 = vsub.f32 %v2325_v37, %v502_v28 }
  0x3d   : > { %v464_v39 = vsel %vm4365_vm0, %v453_v41, %v455_v61  ;;  %v539_v15 = vmul.f32 2.0, %v2185_v18  ;;  %v2463_v45 = vsub.f32 %v2320_v35, %v2336_v51  ;;  %v2467_v46 = vsub.f32 %v2271_v59, %v2281_v63 }
  0x3e   : > { %624 = vrot.lane.b32.xlu1 %v2385_v52, %s2071_s10  ;;  %622 = vrot.lane.b32.xlu0 %v2391_v30, %s2071_s10  ;;  %v503_v40 = vsel %vm4363_vm1, %v498_v42, %v500_v24  ;;  %v2475_v36 = vsub.f32 %v478_v62, %v517_v9  ;;  %v2477_v19 = vsub.f32 %v480_v11, %v519_v22  ;;  %v447_v35 = vrot.slane %v2161_v10, 7 }
  0x3f   : > { %v2454_v27 = vsub.f32 %v464_v39, %v503_v40  ;;  %v559_v37 = vadd.f32 %v539_v15, %v464_v39  ;;  %v492_v51 = vrot.slane %v2165_v12, 1  ;;  %v541_v59 = vmul.f32 2.0, %v2189_v20 }
  0x40   : > { %v2486_v63 = vsub.f32 %v474_v38, %v513_v4  ;;  %v2488_v55 = vsub.f32 %v476_v17, %v515_v0  ;;  %v531_v62 = vmul.f32 2.0, %v2161_v10  ;;  %v462_v11 = vsel %vm4365_vm0, %v455_v61, %v457_v56 }
  0x41   : > { %v2469_v28 = vadd.f32 %v559_v37, %v503_v40  ;;  %v521_v9 = vsel %vm4363_vm1, %v500_v24, %v482_v2  ;;  %v472_v22 = vsel %vm4365_vm0, %v445_v31, %v447_v35  ;;  %v511_v38 = vsel %vm4363_vm1, %v490_v34, %v492_v51 }
  0x42   : > { %628 = vrot.lane.b32.xlu1 %v2401_v6, %s2071_s10  ;;  %626 = vrot.lane.b32.xlu0 %v2403_v7, %s2071_s10  ;;  %v561_v17 = vadd.f32 %v541_v59, %v462_v11  ;;  %v2507_v10 = vsub.f32 %v462_v11, %v521_v9  ;;  %v2509_v20 = vsub.f32 %v472_v22, %v511_v38  ;;  %v990_v3 = vadd.s32 40, %v2195_v29 }
  0x43   : > { %v551_v1 = vadd.f32 %v531_v62, %v472_v22 }
  0x44   : > { %v581_v56 = vadd.f32 %v561_v17, %v521_v9 }
  0x45   : > { %v571_v2 = vadd.f32 %v551_v1, %v511_v38 }
  0x46   : > { %748 = vrot.lane.b32.xlu1 %v2422_v33, %s2072_s11  ;;  %746 = vrot.lane.b32.xlu0 %v2414_v54, %s2072_s11 }
  0x4a   : > { %752 = vrot.lane.b32.xlu1 %v2441_v47, %s2072_s11  ;;  %750 = vrot.lane.b32.xlu0 %v2433_v32, %s2072_s11 }
  0x4e   : > { %764 = vrot.lane.b32.xlu1 %v2463_v45, %s2072_s11  ;;  %754 = vrot.lane.b32.xlu0 %v2467_v46, %s2072_s11 }
  0x52   : > { %768 = vrot.lane.b32.xlu1 %v2475_v36, %s2072_s11  ;;  %766 = vrot.lane.b32.xlu0 %v2477_v19, %s2072_s11 }
  0x56   : > { %772 = vrot.lane.b32.xlu1 %v2486_v63, %s2072_s11  ;;  %770 = vrot.lane.b32.xlu0 %v2488_v55, %s2072_s11 }
  0x5a   : > { %784 = vrot.lane.b32.xlu1 %v2507_v10, %s2072_s11  ;;  %774 = vrot.lane.b32.xlu0 %v2509_v20, %s2072_s11 }
  0x5e   : > { %640 = vrot.lane.b32.xlu1 %v581_v56, %s2071_s10  ;;  %630 = vrot.lane.b32.xlu0 %v571_v2, %s2071_s10 }
  0x62   : > { %667 = vrot.lane.b32.xlu1 %v2267_v58, %s2072_s11  ;;  %665 = vrot.lane.b32.xlu0 %v2248_v50, %s2072_s11  ;;  %v449_v50 = vrot.slane %v2165_v12, 7  ;;  %v494_v58 = vrot.slane %v2173_v14, 1 }
  0x66   : > { %671 = vrot.lane.b32.xlu1 %v2264_v57, %s2072_s11  ;;  %669 = vrot.lane.b32.xlu0 %v2245_v49, %s2072_s11  ;;  %v470_v49 = vsel %vm4365_vm0, %v447_v35, %v449_v50  ;;  %v509_v57 = vsel %vm4363_vm1, %v492_v51, %v494_v58  ;;  %v537_v51 = vmul.f32 2.0, %v2181_v16 }
  0x6a   : > { %683 = vrot.lane.b32.xlu1 %v2353_v60, %s2072_s11  ;;  %673 = vrot.lane.b32.xlu0 %v2302_v26, %s2072_s11  ;;  %v2545_v26 = vsub.f32 %v470_v49, %v509_v57  ;;  %v533_v60 = vmul.f32 2.0, %v2165_v12  ;;  %v535_v12 = vmul.f32 2.0, %v2173_v14 }
  0x6c   : > { %v553_v31 = vadd.f32 %v533_v60, %v470_v49 }
  0x6e   : > { %687 = vrot.lane.b32.xlu1 %v2385_v52, %s2072_s11  ;;  %685 = vrot.lane.b32.xlu0 %v2391_v30, %s2072_s11  ;;  %v573_v34 = vadd.f32 %v553_v31, %v509_v57  ;;  %v451_v52 = vrot.slane %v2173_v14, 7  ;;  %v496_v30 = vrot.slane %v2181_v16, 1 }
  0x70   : > { %v468_v8 = vsel %vm4365_vm0, %v449_v50, %v451_v52  ;;  %v507_v4 = vsel %vm4363_vm1, %v494_v58, %v496_v30  ;;  %v466_v39 = vsel %vm4365_vm0, %v451_v52, %v453_v41  ;;  %v505_v40 = vsel %vm4363_vm1, %v496_v30, %v498_v42 }
  0x71   : > { %v2589_v0 = vsub.f32 %v468_v8, %v507_v4  ;;  %v2621_v35 = vsub.f32 %v466_v39, %v505_v40  ;;  %v557_v18 = vadd.f32 %v537_v51, %v466_v39 }
  0x72   : > { %691 = vrot.lane.b32.xlu1 %v2401_v6, %s2072_s11  ;;  %689 = vrot.lane.b32.xlu0 %v2403_v7, %s2072_s11  ;;  %v555_v6 = vadd.f32 %v535_v12, %v468_v8  ;;  %v2705_v12 = vstv %s1976_s16  ;;  %v988_v8 = vadd.s32 24, %v2195_v29 }
  0x73   : > { %v577_v16 = vadd.f32 %v557_v18, %v505_v40  ;;  %v998_v51 = vadd.s32 %v2705_v12, %v2195_v29  ;;  %v989_v18 = vadd.s32 32, %v2195_v29 }
  0x74   : > { %v575_v14 = vadd.f32 %v555_v6, %v507_v4  ;;  %v987_v4 = vadd.s32 16, %v2195_v29 }
  0x75   : > { %vm1008_vm4 = vcmp.ge.s32.totalorder %v998_v51, 0  ;;  %vm1018_vm5 = vcmp.lt.s32.totalorder %v998_v51, 64  ;;  %v2849_v51 = vmul.f32 2.0, %v2589_v0 }
  0x76   : > { %703 = vrot.lane.b32.xlu1 %v581_v56, %s2072_s11  ;;  %693 = vrot.lane.b32.xlu0 %v571_v2, %s2072_s11  ;;  %vm2742_vm13 = vmand %vm1008_vm4, %vm1018_vm5 }
  0x77   : > { %4404 = vst [vmem:[#allocation21_spill] sm:$0xff] %v2849_v51  ;;  %v993_v51 = vadd.s32 64, %v2195_v29 }
  0x7a   : > { %776 = vrot.lane.b32.xlu1 %v2545_v26, %s2072_s11  ;;  %756 = vrot.lane.b32.xlu0 %v2407_v25, %s2072_s11 }
  0x7e   : > { %848 = vrot.lane.b32.xlu1 %v2422_v33, %s2071_s10  ;;  %846 = vrot.lane.b32.xlu0 %v2414_v54, %s2071_s10 }
  0x82   : > { %852 = vrot.lane.b32.xlu1 %v2441_v47, %s2071_s10  ;;  %850 = vrot.lane.b32.xlu0 %v2433_v32, %s2071_s10 }
  0x86   : > { %864 = vrot.lane.b32.xlu1 %v2463_v45, %s2071_s10  ;;  %854 = vrot.lane.b32.xlu0 %v2467_v46, %s2071_s10 }
  0x8a   : > { %868 = vrot.lane.b32.xlu1 %v2475_v36, %s2071_s10  ;;  %866 = vrot.lane.b32.xlu0 %v2477_v19, %s2071_s10 }
  0x8e   : > { %872 = vrot.lane.b32.xlu1 %v2486_v63, %s2071_s10  ;;  %870 = vrot.lane.b32.xlu0 %v2488_v55, %s2071_s10 }
  0x92   : > { %884 = vrot.lane.b32.xlu1 %v2507_v10, %s2071_s10  ;;  %874 = vrot.lane.b32.xlu0 %v2509_v20, %s2071_s10 }
  0x96   : > { %675 = vrot.lane.b32.xlu1 %v2289_v21, %s2072_s11  ;;  %632 = vrot.lane.b32.xlu0 %v573_v34, %s2071_s10 }
  0x9a   : > { %758 = vrot.lane.b32.xlu1 %v2410_v13, %s2072_s11  ;;  %695 = vrot.lane.b32.xlu0 %v573_v34, %s2072_s11  ;;  %v986_v34 = vadd.s32 8, %v2195_v29 }
  0x9c   : > { %v2591_v7 = vpop.permute.xlu1 %606  ;;  %v2593_v21 = vpop.permute.xlu0 %602  ;;  %v999_v6 = vadd.s32 %v2705_v12, %v986_v34  ;;  %v1000_v34 = vadd.s32 %v2705_v12, %v987_v4  ;;  %v991_v4 = vadd.s32 48, %v2195_v29 }
  0x9e   : > { %856 = vrot.lane.b32.xlu1 %v2407_v25, %s2071_s10  ;;  %778 = vrot.lane.b32.xlu0 %v2589_v0, %s2072_s11  ;;  %vm1009_vm2 = vcmp.ge.s32.totalorder %v999_v6, 0  ;;  %vm1019_vm3 = vcmp.lt.s32.totalorder %v999_v6, 64  ;;  %vm1010_vm10 = vcmp.ge.s32.totalorder %v1000_v34, 0  ;;  %vm1020_vm11 = vcmp.lt.s32.totalorder %v1000_v34, 64 }
  0x9f   : > { %vm2734_vm9 = vmand %vm1009_vm2, %vm1019_vm3  ;;  %v2846_v6 = vmul.f32 2.0, %v2410_v13 }
  0xa0   : > { %v2599_v61 = vpop.permute.xlu1 %608  ;;  %v2601_v24 = vpop.permute.xlu0 %604  ;;  %vm2761_vm1 = vmand %vm1010_vm10, %vm1020_vm11 }
  0xa1   : > { %4403 = vst [vmem:[#allocation20_spill] sm:$0xff] %v2846_v6  ;;  %v2928_v6 = vmul.f32 2.0, %v2444_v48 }
  0xa2   : > { %634 = vrot.lane.b32.xlu1 %v575_v14, %s2071_s10  ;;  %876 = vrot.lane.b32.xlu0 %v2545_v26, %s2071_s10 }
  0xa3   : > { %4410 = vst [vmem:[#allocation25_spill] sm:$0xff] %v2928_v6 }
  0xa4   : > { %v2614_v15 = vpop.permute.xlu1 %612  ;;  %v2616_v37 = vpop.permute.xlu0 %610 }
  0xa5   : > { %4379 = vst [vmem:[#allocation7_spill] sm:$0xff] %v2614_v15  ;;  %4380 = vst [vmem:[#allocation8_spill] sm:$0xff] %v2616_v37 }
  0xa6   : > { %697 = vrot.lane.b32.xlu1 %v575_v14, %s2072_s11  ;;  %677 = vrot.lane.b32.xlu0 %v2330_v44, %s2072_s11  ;;  %v994_v14 = vadd.s32 72, %v2195_v29 }
  0xa8   : > { %v2624_v59 = vpop.permute.xlu1 %616  ;;  %v2626_v41 = vpop.permute.xlu0 %614 }
  0xa9   : > { %4381 = vst [vmem:[#allocation9_spill] sm:$0xff] %v2624_v59  ;;  %4382 = vst [vmem:[#allocation10_spill] sm:$0xff] %v2626_v41  ;;  %v1007_v59 = vadd.s32 %v2705_v12, %v994_v14  ;;  %v2740_v14 = vmul.f32 2.0, %v2475_v36 }
  0xaa   : > { %780 = vrot.lane.b32.xlu1 %v2621_v35, %s2072_s11  ;;  %760 = vrot.lane.b32.xlu0 %v2425_v53, %s2072_s11 }
  0xab   : > { %vm1017_vm14 = vcmp.ge.s32.totalorder %v1007_v59, 0  ;;  %vm1027_vm15 = vcmp.lt.s32.totalorder %v1007_v59, 64 }
  0xac   : > { %v2632_v42 = vpop.permute.xlu1 %620  ;;  %v2634_v62 = vpop.permute.xlu0 %618 }
  0xad   : > { %4383 = vst [vmem:[#allocation11_spill] sm:$0xff] %v2632_v42  ;;  %4384 = vst [vmem:[#allocation12_spill] sm:$0xff] %v2634_v62  ;;  %v2721_v62 = vand.u32 127, %v458_v23  ;;  %v1003_v23 = vadd.s32 %v2705_v12, %v990_v3  ;;  %v808_v3 = vmul.f32 2.0, %v2422_v33  ;;  %v2767_v33 = vmul.f32 2.0, %v2477_v19 }
  0xae   : > { %878 = vrot.lane.b32.xlu1 %v2589_v0, %s2071_s10  ;;  %858 = vrot.lane.b32.xlu0 %v2410_v13, %s2071_s10  ;;  %v2773_v42 = vmul.f32 2.0, %v2486_v63  ;;  %v2788_v19 = vmul.f32 2.0, %v2463_v45  ;;  %v2794_v63 = vmul.f32 2.0, %v2467_v46  ;;  %v2809_v45 = vmul.f32 2.0, %v2545_v26 }
  0xaf   : > { %v1058_v37 = vadd.s32 128, %v2721_v62  ;;  %vm644_vm8 = vcmp.lt.s32.totalorder %v2721_v62, 127  ;;  %vm1013_vm0 = vcmp.ge.s32.totalorder %v1003_v23, 0  ;;  %vm1023_vm12 = vcmp.lt.s32.totalorder %v1003_v23, 64 }
  0xb0   : > { %v2640_v44 = vpop.permute.xlu1 %624  ;;  %v2642_v11 = vpop.permute.xlu0 %622  ;;  %vm1033_vm10 = vmand %vm1013_vm0, %vm1023_vm12 }
  0xb1   : > { %vm1060_vm5 = vcmp.lt.s32.totalorder %v1058_v37, 200  ;;  %v2861_v34 = vsel %vm644_vm8, %v2601_v24, %v2640_v44  ;;  %v2867_v13 = vsel %vm644_vm8, %v2640_v44, %v2601_v24  ;;  %v2873_v0 = vsel %vm644_vm8, %v2593_v21, %v2642_v11 }
  0xb2   : > { %679 = vrot.lane.b32.xlu1 %v2328_v43, %s2072_s11  ;;  %636 = vrot.lane.b32.xlu0 %v577_v16, %s2071_s10  ;;  %v2888_v24 = vsel %vm644_vm8, %v2642_v11, %v2593_v21 }
  0xb4   : > { %v2647_v9 = vpop.permute.xlu1 %628  ;;  %v2649_v22 = vpop.permute.xlu0 %626 }
  0xb5   : > { %v2894_v44 = vsel %vm644_vm8, %v2599_v61, %v2647_v9  ;;  %v2911_v21 = vsel %vm644_vm8, %v2591_v7, %v2649_v22  ;;  %v2917_v11 = vsel %vm644_vm8, %v2649_v22, %v2591_v7 }
  0xb6   : > { %762 = vrot.lane.b32.xlu1 %v2444_v48, %s2072_s11  ;;  %699 = vrot.lane.b32.xlu0 %v577_v16, %s2072_s11  ;;  %v1001_v16 = vadd.s32 %v2705_v12, %v988_v8  ;;  %v1002_v8 = vadd.s32 %v2705_v12, %v989_v18  ;;  %v2748_v18 = vmul.f32 2.0, %v2414_v54  ;;  %v1004_v54 = vadd.s32 %v2705_v12, %v991_v4 }
  0xb7   : > { %v2785_v4 = vmul.f32 2.0, %v2488_v55  ;;  %v2806_v55 = vmul.f32 2.0, %v2407_v25 }
  0xb8   : > { %v2654_v38 = vpop.permute.xlu1 %748  ;;  %v2656_v17 = vpop.permute.xlu0 %746  ;;  %vm1011_vm6 = vcmp.ge.s32.totalorder %v1001_v16, 0  ;;  %vm1021_vm7 = vcmp.lt.s32.totalorder %v1001_v16, 64  ;;  %vm1012_vm3 = vcmp.ge.s32.totalorder %v1002_v8, 0  ;;  %vm1022_vm4 = vcmp.lt.s32.totalorder %v1002_v8, 64 }
  0xb9   : > { %vm2756_vm2 = vmand %vm1011_vm6, %vm1021_vm7  ;;  %v2770_v16 = vmul.f32 2.0, %v2441_v47  ;;  %v2791_v47 = vmul.f32 2.0, %v2507_v10  ;;  %v4400_v10 = vmov 0.0   ;;  %vm1014_vm11 = vcmp.ge.s32.totalorder %v1004_v54, 0 }
  0xba   : > { %860 = vrot.lane.b32.xlu1 %v2425_v53, %s2071_s10  ;;  %782 = vrot.lane.b32.xlu0 %v2454_v27, %s2072_s11  ;;  %vm2780_vm6 = vmand %vm1017_vm14, %vm1027_vm15  ;;  %v2813_v46 = vsel %vm1060_vm5, 1.0, %v4400_v10  ;;  %v2825_v25 = vsel %vm2742_vm13, 1.0, %v4400_v10  ;;  %vm1024_vm14 = vcmp.lt.s32.totalorder %v1004_v54, 64  ;;  %v2830_v26 = vsel %vm2756_vm2, 1.0, %v4400_v10 }
  0xbb   : > { %vm1032_vm7 = vmand %vm1012_vm3, %vm1022_vm4  ;;  %v2835_v37 = vsel %vm2761_vm1, 1.0, %v4400_v10  ;;  %v2840_v8 = vsel %vm2780_vm6, 1.0, %v4400_v10  ;;  %v2852_v36 = vsel %vm1033_vm10, 1.0, %v4400_v10  ;;  %vm4408_vm1 = vcmp.lt.s32.totalorder %v2721_v62, 1 }
  0xbc   : > { %v2662_v43 = vpop.permute.xlu1 %752  ;;  %v2664_v1 = vpop.permute.xlu0 %750  ;;  %4401 = vst [vmem:[#allocation18_spill] sm:$0xff] %v2840_v8  ;;  %v2843_v23 = vsel %vm1032_vm7, 1.0, %v4400_v10  ;;  %4405 = vst [vmem:[#allocation22_spill] sm:$0xff] %v2852_v36  ;;  %v2880_v36 = vmul.f32 2.0, %v2621_v35  ;;  %v992_v54 = vadd.s32 56, %v2195_v29 }
  0xbd   : > { %4402 = vst [vmem:[#allocation19_spill] sm:$0xff] %v2843_v23  ;;  %vm1034_vm0 = vmand %vm1014_vm11, %vm1024_vm14  ;;  %v2931_v23 = vmul.f32 2.0, %v2454_v27 }
  0xbe   : > { %638 = vrot.lane.b32.xlu1 %v2469_v28, %s2071_s10  ;;  %880 = vrot.lane.b32.xlu0 %v2621_v35, %s2071_s10  ;;  %4407 = vst [vmem:[#allocation24_spill] sm:$0xff] %v2880_v36  ;;  %v2905_v36 = vsel %vm644_vm8, %v2647_v9, %v2599_v61  ;;  %v2925_v9 = vsel %vm1034_vm0, 1.0, %v4400_v10  ;;  %vm4412_vm12 = vmmov %vm4408_vm1 }
  0xbf   : > { %4411 = vst [vmem:[#allocation26_spill] sm:$0xff] %v2931_v23  ;;  %vm4413_vm13 = vmmov %vm4408_vm1  ;;  %v1006_v23 = vadd.s32 %v2705_v12, %v993_v51 }
  0xc0   : > { %v2670_v56 = vpop.permute.xlu1 %764  ;;  %v2672_v2 = vpop.permute.xlu0 %754  ;;  %vm4414_vm15 = vmmov %vm4408_vm1 }
  0xc1   : > { %vm4415_vm2 = vmmov %vm4408_vm1 }
  0xc2   : > { %701 = vrot.lane.b32.xlu1 %v2469_v28, %s2072_s11  ;;  %681 = vrot.lane.b32.xlu0 %v2358_v5, %s2072_s11  ;;  %vm4416_vm3 = vmmov %vm4408_vm1 }
  0xc3   : > { %vm4417_vm4 = vmmov %vm4408_vm1 }
  0xc4   : > { %v2678_v50 = vpop.permute.xlu1 %768  ;;  %v2680_v58 = vpop.permute.xlu0 %766  ;;  %vm4418_vm5 = vmmov %vm4408_vm1 }
  0xc5   : > { %v797_v35 = vsel %vm4408_vm1, %v2678_v50, %v2654_v38  ;;  %v786_v7 = vsel %vm4412_vm12, %v2656_v17, %v2680_v58  ;;  %v796_v22 = vsel %vm4413_vm13, %v2680_v58, %v2656_v17  ;;  %v1005_v58 = vadd.s32 %v2705_v12, %v992_v54  ;;  %vm4419_vm6 = vmmov %vm4408_vm1 }
  0xc6   : > { %882 = vrot.lane.b32.xlu1 %v2454_v27, %s2071_s10  ;;  %862 = vrot.lane.b32.xlu0 %v2444_v48, %s2071_s10  ;;  %v2933_v8 = vadd.f32 %v808_v3, %v797_v35  ;;  %vm4420_vm7 = vmmov %vm4408_vm1  ;;  %v2984_v54 = vadd.f32 %v2767_v33, %v786_v7  ;;  %v4432_v7 = vld [vmem:[#allocation11_spill] sm:$0xff] }
  0xc7   : > { %vm4421_vm10 = vmmov %vm4408_vm1  ;;  %vm1015_vm11 = vcmp.ge.s32.totalorder %v1005_v58, 0 }
  0xc8   : > { %v2686_v49 = vpop.permute.xlu1 %772  ;;  %v2688_v57 = vpop.permute.xlu0 %770  ;;  %vm4422_vm14 = vmmov %vm4408_vm1 }
  0xc9   : > { %v799_v48 = vsel %vm4414_vm15, %v2686_v49, %v2662_v43  ;;  %v788_v3 = vsel %vm4416_vm3, %v2664_v1, %v2688_v57  ;;  %v798_v17 = vsel %vm4417_vm4, %v2688_v57, %v2664_v1  ;;  %v2981_v57 = vadd.f32 %v2748_v18, %v796_v22  ;;  %vm4423_vm0 = vmmov %vm4408_vm1 }
  0xca   : > { %v2987_v6 = vadd.f32 %v2770_v16, %v799_v48  ;;  %v2996_v12 = vadd.f32 %v2785_v4, %v788_v3  ;;  %vm4424_vm12 = vmmov %vm4423_vm0 }
  0xcb   : > { %vm4425_vm13 = vmmov %vm4423_vm0 }
  0xcc   : > { %v2690_v60 = vpop.permute.xlu1 %784  ;;  %v2692_v28 = vpop.permute.xlu0 %774  ;;  %vm4426_vm15 = vmmov %vm4423_vm0 }
  0xcd   : > { %v795_v35 = vsel %vm4418_vm5, %v2670_v56, %v2690_v60  ;;  %vm4427_vm3 = vmmov %vm4423_vm0 }
  0xce   : > { %v3006_v16 = vadd.f32 %v2791_v47, %v795_v35  ;;  %vm4429_vm4 = vmmov %vm4423_vm0 }
  0xcf   : > { %vm4430_vm5 = vmmov %vm4423_vm0 }
  0xd0   : > { %v2694_v31 = vpop.permute.xlu1 %640  ;;  %v2696_v5 = vpop.permute.xlu0 %630 }
  0xd1   : > { %4385 = vst [vmem:[#allocation13_spill] sm:$0xff] %v2694_v31  ;;  %4386 = vst [vmem:[#allocation14_spill] sm:$0xff] %v2696_v5  ;;  %v2776_v31 = vmul.f32 2.0, %v2433_v32  ;;  %v2799_v32 = vmul.f32 2.0, %v2509_v20  ;;  %v2820_v20 = vsel %vm2734_vm9, 1.0, %v4400_v10 }
  0xd2   : > { %vm4409_vm9 = vmmov %vm4408_vm1  ;;  %vm1025_vm1 = vcmp.lt.s32.totalorder %v1005_v58, 64  ;;  %v4438_v58 = vld [vmem:[#allocation8_spill] sm:$0xff] }
  0xd3   : > { %v787_v61 = vsel %vm4409_vm9, %v2654_v38, %v2678_v50  ;;  %v789_v50 = vsel %vm4415_vm2, %v2662_v43, %v2686_v49  ;;  %v805_v43 = vsel %vm4419_vm6, %v2690_v60, %v2670_v56  ;;  %v800_v49 = vsel %vm4420_vm7, %v2692_v28, %v2672_v2  ;;  %vm4434_vm6 = vmmov %vm4423_vm0 }
  0xd4   : > { %v2701_v52 = vpop.permute.xlu1 %667  ;;  %v2703_v30 = vpop.permute.xlu0 %665  ;;  %v2978_v1 = vadd.f32 %v2740_v14, %v787_v61  ;;  %v2990_v56 = vadd.f32 %v2773_v42, %v789_v50  ;;  %v2993_v60 = vadd.f32 %v2776_v31, %v798_v17  ;;  %v790_v14 = vsel %vm4421_vm10, %v2672_v2, %v2692_v28  ;;  %vm3060_vm7 = vmand %vm1015_vm11, %vm1025_vm1 }
  0xd5   : > { %v3003_v51 = vadd.f32 %v2788_v19, %v805_v43  ;;  %v3009_v42 = vadd.f32 %v2794_v63, %v800_v49  ;;  %vm1016_vm9 = vcmp.ge.s32.totalorder %v1006_v23, 0  ;;  %vm1026_vm2 = vcmp.lt.s32.totalorder %v1006_v23, 64  ;;  %vm4439_vm11 = vmmov %vm4423_vm0 }
  0xd6   : > { %vm1036_vm10 = vmand %vm1016_vm9, %vm1026_vm2 }
  0xd7   : > { %vm4442_vm1 = vmmov %vm4423_vm0 }
  0xd8   : > { %v2711_v39 = vpop.permute.xlu1 %671  ;;  %v2713_v40 = vpop.permute.xlu0 %669  ;;  %v4437_v35 = vld [vmem:[#allocation14_spill] sm:$0xff]  ;;  %vm4443_vm9 = vmmov %vm4423_vm0 }
  0xd9   : > { %4387 = vst [vmem:[#allocation15_spill] sm:$0xff] %v2713_v40  ;;  %v649_v43 = vsel %vm644_vm8, %v4438_v58, %v4437_v35 }
  0xdc   : > { %v2725_v41 = vpop.permute.xlu1 %683  ;;  %v2727_v15 = vpop.permute.xlu0 %673 }
  0xdd   : > { %4388 = vst [vmem:[#allocation16_spill] sm:$0xff] %v2725_v41  ;;  %4389 = vst [vmem:[#allocation17_spill] sm:$0xff] %v2727_v15  ;;  %v2855_v41 = vmul.f32 2.0, %v2425_v53 }
  0xdf   : > { %4406 = vst [vmem:[#allocation23_spill] sm:$0xff] %v2855_v41 }
  0xe0   : > { %v2750_v15 = vpop.permute.xlu1 %687  ;;  %v2752_v5 = vpop.permute.xlu0 %685  ;;  %v4428_v47 = vld [vmem:[#allocation15_spill] sm:$0xff] }
  0xe1   : > { %v707_v31 = vsel %vm4422_vm14, %v2701_v52, %v2750_v15  ;;  %v717_v2 = vsel %vm4423_vm0, %v2750_v15, %v2701_v52  ;;  %v706_v28 = vsel %vm4424_vm12, %v2703_v30, %v2752_v5  ;;  %v716_v4 = vsel %vm4425_vm13, %v2752_v5, %v2703_v30  ;;  %vm4441_vm14 = vmmov %vm4423_vm0 }
  0xe2   : > { %v3032_v15 = vadd.f32 %v2799_v32, %v790_v14  ;;  %v4431_v32 = vld [vmem:[#allocation13_spill] sm:$0xff]  ;;  %vm4444_vm12 = vcmp.lt.s32.totalorder %v2195_v29, 1 }
  0xe3   : > { %v654_v22 = vsel %vm644_vm8, %v4432_v7, %v4431_v32  ;;  %v664_v3 = vsel %vm644_vm8, %v4431_v32, %v4432_v7  ;;  %vm4445_vm13 = vmmov %vm4444_vm12 }
  0xe4   : > { %v2801_v59 = vpop.permute.xlu1 %691  ;;  %v2803_v40 = vpop.permute.xlu0 %689  ;;  %v4433_v48 = vld [vmem:[#allocation16_spill] sm:$0xff]  ;;  %v4440_v23 = vld [vmem:[#allocation17_spill] sm:$0xff]  ;;  %vm4448_vm2 = vmmov %vm4444_vm12 }
  0xe5   : > { %v719_v19 = vsel %vm4426_vm15, %v2801_v59, %v2711_v39  ;;  %v709_v52 = vsel %vm4427_vm3, %v2711_v39, %v2801_v59  ;;  %v708_v63 = vsel %vm4429_vm4, %v4428_v47, %v2803_v40  ;;  %v718_v5 = vsel %vm4430_vm5, %v2803_v40, %v4428_v47  ;;  %vm4451_vm4 = vmmov %vm4448_vm2 }
  0xe6   : > { %v728_v39 = vsub.f32 %v2861_v34, %v717_v2  ;;  %v729_v59 = vsub.f32 %v2867_v13, %v707_v31  ;;  %v726_v34 = vsub.f32 %v2873_v0, %v716_v4  ;;  %v727_v13 = vsub.f32 %v2888_v24, %v706_v28  ;;  %vm4452_vm5 = vmmov %vm4423_vm0 }
  0xe7   : > { %v732_v17 = vsub.f32 %v2894_v44, %v719_v19  ;;  %v733_v49 = vsub.f32 %v2905_v36, %v709_v52  ;;  %v730_v14 = vsub.f32 %v2911_v21, %v718_v5  ;;  %v731_v31 = vsub.f32 %v2917_v11, %v708_v63 }
  0xe8   : > { %v2875_v53 = vpop.permute.xlu1 %703  ;;  %v2877_v41 = vpop.permute.xlu0 %693  ;;  %v928_v11 = vand.u32 2147483647, %v728_v39  ;;  %v929_v28 = vand.u32 2147483647, %v729_v59  ;;  %v3102_v4 = vsel %vm1036_vm10, 1.0, %v4400_v10  ;;  %v659_v19 = vsel %vm644_vm8, %v4437_v35, %v4438_v58  ;;  %vm4456_vm10 = vmmov %vm4423_vm0 }
  0xe9   : > { %v725_v50 = vsel %vm4434_vm6, %v2875_v53, %v4433_v48  ;;  %v715_v0 = vsel %vm4439_vm11, %v4433_v48, %v2875_v53  ;;  %v710_v44 = vsel %vm4441_vm14, %v4440_v23, %v2877_v41  ;;  %v720_v36 = vsel %vm4423_vm0, %v2877_v41, %v4440_v23  ;;  %vm4453_vm6 = vmmov %vm4423_vm0 }
  0xea   : > { %v744_v24 = vsub.f32 %v654_v22, %v725_v50  ;;  %v3099_v53 = vsel %vm3060_vm7, 1.0, %v4400_v10  ;;  %v926_v41 = vand.u32 2147483647, %v726_v34  ;;  %v927_v52 = vand.u32 2147483647, %v727_v13  ;;  %vm4457_vm11 = vmmov %vm4423_vm0 }
  0xeb   : > { %v932_v47 = vand.u32 2147483647, %v732_v17  ;;  %v933_v63 = vand.u32 2147483647, %v733_v49  ;;  %v745_v5 = vsub.f32 %v664_v3, %v715_v0  ;;  %v734_v32 = vsub.f32 %v649_v43, %v720_v36  ;;  %vm4460_vm14 = vmmov %vm4448_vm2 }
  0xec   : > { %v2947_v38 = vpop.permute.xlu1 %776  ;;  %v2949_v27 = vpop.permute.xlu0 %756  ;;  %v735_v7 = vsub.f32 %v659_v19, %v710_v44  ;;  %v930_v22 = vand.u32 2147483647, %v730_v14  ;;  %v3108_v39 = vand.u32 2147483647, %v731_v31  ;;  %v3110_v59 = vand.u32 2147483647, %v744_v24 }
  0xed   : > { %v801_v48 = vsel %vm4442_vm1, %v2947_v38, %v2949_v27  ;;  %v3128_v14 = vand.u32 2147483647, %v745_v5  ;;  %v3130_v31 = vand.u32 2147483647, %v734_v32  ;;  %vm4446_vm15 = vcmp.lt.s32.totalorder %v2195_v29, 7 }
  0xee   : > { %v3132_v0 = vand.u32 2147483647, %v735_v7  ;;  %vm4449_vm3 = vmmov %vm4446_vm15  ;;  %vm1243_vm1 = vcmp.lt.s32.totalorder %v2195_v29, 3 }
  0xef   : > { %vm4455_vm7 = vmmov %vm4449_vm3 }
  0xf0   : > { %v849_v18 = vpop.permute.xlu1 %848  ;;  %v847_v33 = vpop.permute.xlu0 %846  ;;  %vm4461_vm0 = vmmov %vm4449_vm3 }
  0xf4   : > { %v853_v30 = vpop.permute.xlu1 %852  ;;  %v3046_v61 = vpop.permute.xlu0 %850 }
  0xf8   : > { %v3092_v2 = vpop.permute.xlu1 %864  ;;  %v3094_v21 = vpop.permute.xlu0 %854 }
  0xfc   : > { %v869_v50 = vpop.permute.xlu1 %868  ;;  %v867_v40 = vpop.permute.xlu0 %866 }
  0xfd   : > { %v887_v34 = vsel %vm644_vm8, %v849_v18, %v869_v50  ;;  %v897_v3 = vsel %vm644_vm8, %v869_v50, %v849_v18  ;;  %v886_v13 = vsel %vm644_vm8, %v847_v33, %v867_v40  ;;  %v896_v17 = vsel %vm644_vm8, %v867_v40, %v847_v33 }
  0xfe   : > { %v908_v35 = vadd.f32 %v887_v34, %v2933_v8  ;;  %v909_v58 = vadd.f32 %v897_v3, %v2978_v1  ;;  %v906_v43 = vadd.f32 %v886_v13, %v2981_v57  ;;  %v907_v49 = vadd.f32 %v896_v17, %v2984_v54 }
  0xff   : > { %v791_v18 = vsel %vm4443_vm9, %v2949_v27, %v2947_v38  ;;  %v3139_v33 = vadd.f32 %v2806_v55, %v801_v48  ;;  %vm1278_vm9 = vcmp.lt.s32.totalorder %v2195_v29, 5 }
 0x100   : > { %v948_v8 = vand.u32 2147483647, %v908_v35  ;;  %v949_v1 = vand.u32 2147483647, %v909_v58  ;;  %v946_v24 = vand.u32 2147483647, %v906_v43  ;;  %v873_v57 = vpop.permute.xlu1 %872  ;;  %v871_v23 = vpop.permute.xlu0 %870 }
 0x101   : > { %v947_v54 = vand.u32 2147483647, %v907_v49  ;;  %v889_v44 = vsel %vm644_vm8, %v853_v30, %v873_v57  ;;  %v899_v36 = vsel %vm644_vm8, %v873_v57, %v853_v30  ;;  %v888_v19 = vsel %vm644_vm8, %v3046_v61, %v871_v23 }
 0x102   : > { %v968_v38 = vadd.f32 %v948_v8, %v928_v11  ;;  %v969_v27 = vadd.f32 %v949_v1, %v929_v28  ;;  %v966_v55 = vadd.f32 %v946_v24, %v926_v41  ;;  %v912_v5 = vadd.f32 %v889_v44, %v2987_v6 }
 0x103   : > { %v967_v32 = vadd.f32 %v947_v54, %v927_v52  ;;  %v913_v7 = vadd.f32 %v899_v36, %v2990_v56  ;;  %v898_v48 = vsel %vm644_vm8, %v871_v23, %v3046_v61  ;;  %v910_v50 = vadd.f32 %v888_v19, %v2993_v60 }
 0x104   : > { %v3155_v30 = vmul.f32 %v2820_v20, %v968_v38  ;;  %v1068_v40 = vmul.f32 %v2820_v20, %v969_v27  ;;  %v3159_v11 = vmul.f32 %v2825_v25, %v966_v55  ;;  %v952_v28 = vand.u32 2147483647, %v912_v5  ;;  %v885_v41 = vpop.permute.xlu1 %884  ;;  %v875_v6 = vpop.permute.xlu0 %874 }
 0x105   : > { %v1066_v52 = vmul.f32 %v2825_v25, %v967_v32  ;;  %v953_v56 = vand.u32 2147483647, %v913_v7  ;;  %v911_v34 = vadd.f32 %v898_v48, %v2996_v12  ;;  %v950_v3 = vand.u32 2147483647, %v910_v50 }
 0x106   : > { %v3164_v61 = vadd.f32 %v2809_v45, %v791_v18  ;;  %v3167_v60 = vmul.f32 %v2813_v46, %v1068_v40  ;;  %v1107_v20 = vrot.slane %v3155_v30, 7  ;;  %v1147_v13 = vrot.slane %v3155_v30, 1 }
 0x107   : > { %v3172_v17 = vmul.f32 %v2813_v46, %v1066_v52  ;;  %v1105_v35 = vrot.slane %v3159_v11, 7  ;;  %v972_v25 = vadd.f32 %v952_v28, %v932_v47  ;;  %v973_v58 = vadd.f32 %v953_v56, %v933_v63 }
 0x108   : > { %v1108_v12 = vrot.slane %v3167_v60, 7  ;;  %v1145_v43 = vrot.slane %v3159_v11, 1  ;;  %v951_v45 = vand.u32 2147483647, %v911_v34  ;;  %v970_v49 = vadd.f32 %v950_v3, %v930_v22  ;;  %v676_v18 = vpop.permute.xlu1 %675  ;;  %v633_v8 = vpop.permute.xlu0 %632 }
 0x109   : > { %v1148_v1 = vrot.slane %v3167_v60, 1  ;;  %v1106_v24 = vrot.slane %v3172_v17, 7  ;;  %v3180_v57 = vmul.f32 %v2830_v26, %v972_v25  ;;  %v1072_v23 = vmul.f32 %v2830_v26, %v973_v58 }
 0x10a   : > { %v971_v47 = vadd.f32 %v951_v45, %v3108_v39  ;;  %v3185_v63 = vmul.f32 %v2835_v37, %v970_v49  ;;  %v895_v22 = vsel %vm644_vm8, %v3092_v2, %v885_v41  ;;  %v905_v54 = vsel %vm644_vm8, %v885_v41, %v3092_v2 }
 0x10b   : > { %v3194_v44 = vmul.f32 %v2813_v46, %v1072_v23  ;;  %v1111_v36 = vrot.slane %v3180_v57, 7  ;;  %v1151_v26 = vrot.slane %v3180_v57, 1  ;;  %v924_v39 = vadd.f32 %v895_v22, %v3003_v51  ;;  %v4447_v22 = vld [vmem:[#allocation18_spill] sm:$0xff] }
 0x10c   : > { %v1070_v19 = vmul.f32 %v2835_v37, %v971_v47  ;;  %v1109_v38 = vrot.slane %v3185_v63, 7  ;;  %v1149_v27 = vrot.slane %v3185_v63, 1  ;;  %v925_v55 = vadd.f32 %v905_v54, %v3006_v16  ;;  %v759_v5 = vpop.permute.xlu1 %758  ;;  %v696_v32 = vpop.permute.xlu0 %695 }
 0x10d   : > { %v1112_v2 = vrot.slane %v3194_v44, 7  ;;  %v1152_v7 = vrot.slane %v3194_v44, 1  ;;  %v964_v48 = vand.u32 2147483647, %v924_v39  ;;  %v890_v50 = vsel %vm644_vm8, %v3094_v21, %v875_v6 }
 0x10e   : > { %v3209_v51 = vmul.f32 %v2813_v46, %v1070_v19  ;;  %v3215_v37 = vsel %vm4444_vm12, %v1109_v38, %v1111_v36  ;;  %v1139_v16 = vsel %vm4445_vm13, %v1107_v20, %v1109_v38  ;;  %v1177_v40 = vsel %vm4446_vm15, %v1149_v27, %v1151_v26  ;;  %vm4463_vm12 = vmmov %vm4452_vm5 }
 0x10f   : > { %v1189_v28 = vmax.f32 %v1139_v16, %v1177_v40  ;;  %v965_v41 = vand.u32 2147483647, %v925_v55  ;;  %v984_v52 = vadd.f32 %v964_v48, %v3110_v59  ;;  %v900_v56 = vsel %vm644_vm8, %v875_v6, %v3094_v21  ;;  %v4450_v6 = vld [vmem:[#allocation7_spill] sm:$0xff]  ;;  %vm4464_vm13 = vmmov %vm4452_vm5 }
 0x110   : > { %v1110_v34 = vrot.slane %v3209_v51, 7  ;;  %v1150_v3 = vrot.slane %v3209_v51, 1  ;;  %v914_v25 = vadd.f32 %v890_v50, %v3009_v42  ;;  %v915_v58 = vadd.f32 %v900_v56, %v3032_v15  ;;  %v857_v45 = vpop.permute.xlu1 %856  ;;  %v779_v49 = vpop.permute.xlu0 %778  ;;  %vm4465_vm15 = vmmov %vm4448_vm2 }
 0x111   : > { %v4375_v23 = vrot.slane %v3172_v17, 1  ;;  %v3237_v47 = vmax.f32 %v3185_v63, %v1189_v28  ;;  %v985_v59 = vadd.f32 %v965_v41, %v3128_v14  ;;  %v3241_v54 = vmul.f32 %v4447_v22, %v984_v52 }
 0x112   : > { %v1140_v21 = vsel %vm4448_vm2, %v1108_v12, %v1110_v34  ;;  %v1178_v42 = vsel %vm4449_vm3, %v1150_v3, %v1152_v7  ;;  %v954_v15 = vand.u32 2147483647, %v914_v25  ;;  %v650_v14 = vsel %vm644_vm8, %v4450_v6, %v633_v8  ;;  %vm4466_vm3 = vmmov %vm4448_vm2 }
 0x113   : > { %v3260_v39 = vsel %vm4451_vm4, %v1110_v34, %v1112_v2  ;;  %v1190_v19 = vmax.f32 %v1140_v21, %v1178_v42  ;;  %v1084_v38 = vmul.f32 %v4447_v22, %v985_v59  ;;  %v4372_v55 = vrot.slane %v3241_v54, 1  ;;  %vm4467_vm4 = vmmov %vm4461_vm0 }
 0x114   : > { %v4373_v48 = vrot.slane %v3241_v54, 7  ;;  %v955_v50 = vand.u32 2147483647, %v915_v58  ;;  %v974_v16 = vadd.f32 %v954_v15, %v3130_v31  ;;  %v711_v40 = vsel %vm4452_vm5, %v676_v18, %v696_v32  ;;  %v635_v28 = vpop.permute.xlu1 %634  ;;  %v877_v41 = vpop.permute.xlu0 %876  ;;  %v4454_v58 = vld [vmem:[#allocation19_spill] sm:$0xff]  ;;  %vm4468_vm5 = vmmov %vm4461_vm0 }
 0x115   : > { %v3269_v52 = vmax.f32 %v3209_v51, %v1190_v19  ;;  %v3272_v56 = vmul.f32 %v2813_v46, %v1084_v38  ;;  %v660_v34 = vsel %vm644_vm8, %v633_v8, %v4450_v6  ;;  %v721_v25 = vsel %vm4453_vm6, %v696_v32, %v676_v18  ;;  %vm4469_vm6 = vmmov %vm4461_vm0 }
 0x116   : > { %v975_v31 = vadd.f32 %v955_v50, %v3132_v0  ;;  %v3281_v59 = vmul.f32 %v4454_v58, %v974_v16  ;;  %v736_v22 = vsub.f32 %v650_v14, %v721_v25  ;;  %v737_v21 = vsub.f32 %v660_v34, %v711_v40  ;;  %v4458_v40 = vld [vmem:[#allocation20_spill] sm:$0xff]  ;;  %v4459_v25 = vld [vmem:[#allocation21_spill] sm:$0xff] }
 0x117   : > { %v4374_v42 = vrot.slane %v3272_v56, 7  ;;  %v3290_v15 = vsel %vm4455_vm7, %v4372_v55, %v1145_v43  ;;  %v792_v18 = vsel %vm4456_vm10, %v759_v5, %v779_v49  ;;  %v802_v0 = vsel %vm4457_vm11, %v779_v49, %v759_v5  ;;  %vm4471_vm7 = vmmov %vm4456_vm10 }
 0x118   : > { %v1074_v32 = vmul.f32 %v4454_v58, %v975_v31  ;;  %v1113_v6 = vrot.slane %v3281_v59, 7  ;;  %v1153_v14 = vrot.slane %v3281_v59, 1  ;;  %v698_v19 = vpop.permute.xlu1 %697  ;;  %v678_v38 = vpop.permute.xlu0 %677  ;;  %v936_v50 = vand.u32 2147483647, %v736_v22  ;;  %v4462_v58 = vld [vmem:[#allocation10_spill] sm:$0xff]  ;;  %vm4472_vm10 = vmmov %vm4471_vm7 }
 0x119   : > { %v937_v16 = vand.u32 2147483647, %v737_v21  ;;  %v3301_v34 = vadd.f32 %v4458_v40, %v802_v0  ;;  %v3304_v55 = vadd.f32 %v4459_v25, %v792_v18  ;;  %v651_v22 = vsel %vm644_vm8, %v4462_v58, %v635_v28  ;;  %vm4474_vm11 = vmmov %vm4448_vm2 }
 0x11a   : > { %v3307_v5 = vmul.f32 %v2813_v46, %v1074_v32  ;;  %v3315_v49 = vsel %vm4460_vm14, %v1111_v36, %v1113_v6  ;;  %v1175_v31 = vsel %vm4461_vm0, %v1151_v26, %v1153_v14  ;;  %v661_v18 = vsel %vm644_vm8, %v635_v28, %v4462_v58  ;;  %vm4475_vm14 = vmmov %vm4461_vm0 }
 0x11b   : > { %v1191_v21 = vmax.f32 %v3215_v37, %v1175_v31  ;;  %v891_v36 = vsel %vm644_vm8, %v857_v45, %v877_v41  ;;  %v901_v0 = vsel %vm644_vm8, %v877_v41, %v857_v45  ;;  %v712_v28 = vsel %vm4463_vm12, %v678_v38, %v698_v19  ;;  %vm4476_vm0 = vmmov %vm4448_vm2 }
 0x11c   : > { %v1114_v32 = vrot.slane %v3307_v5, 7  ;;  %v1154_v26 = vrot.slane %v3307_v5, 1  ;;  %v916_v40 = vadd.f32 %v891_v36, %v3139_v33  ;;  %v917_v25 = vadd.f32 %v901_v0, %v3164_v61  ;;  %v781_v8 = vpop.permute.xlu1 %780  ;;  %v761_v37 = vpop.permute.xlu0 %760  ;;  %vm4477_vm12 = vmmov %vm4467_vm4 }
 0x11d   : > { %v722_v45 = vsel %vm4464_vm13, %v698_v19, %v678_v38  ;;  %v1141_v33 = vsel %vm4465_vm15, %v1105_v35, %v1107_v20  ;;  %v1143_v61 = vsel %vm4448_vm2, %v4373_v48, %v1105_v35  ;;  %v739_v58 = vsub.f32 %v661_v18, %v712_v28  ;;  %vm4479_vm13 = vmmov %vm4476_vm0 }
 0x11e   : > { %v3360_v41 = vsel %vm4466_vm3, %v1112_v2, %v1114_v32  ;;  %v3366_v19 = vsel %vm4467_vm4, %v1152_v7, %v1154_v26  ;;  %v956_v20 = vand.u32 2147483647, %v916_v40  ;;  %v957_v38 = vand.u32 2147483647, %v917_v25  ;;  %vm4480_vm15 = vmmov %vm4476_vm0 }
 0x11f   : > { %v738_v31 = vsub.f32 %v651_v22, %v722_v45  ;;  %v1179_v35 = vsel %vm4468_vm5, %v1147_v13, %v1149_v27  ;;  %v1181_v2 = vsel %vm4469_vm6, %v1145_v43, %v1147_v13  ;;  %v3382_v63 = vand.u32 2147483647, %v739_v58  ;;  %v4470_v45 = vld [vmem:[#allocation22_spill] sm:$0xff]  ;;  %vm4481_vm2 = vmmov %vm4467_vm4 }
 0x120   : > { %v976_v7 = vadd.f32 %v956_v20, %v936_v50  ;;  %v977_v36 = vadd.f32 %v957_v38, %v937_v16  ;;  %v1185_v0 = vmax.f32 %v1143_v61, %v1181_v2  ;;  %v1187_v40 = vmax.f32 %v1141_v33, %v1179_v35  ;;  %v879_v22 = vpop.permute.xlu1 %878  ;;  %v859_v18 = vpop.permute.xlu0 %858  ;;  %vm4482_vm3 = vmmov %vm4481_vm2 }
 0x121   : > { %v3380_v25 = vand.u32 2147483647, %v738_v31  ;;  %v1262_v28 = vrot.slane %v3237_v47, 3  ;;  %v3386_v27 = vmax.f32 %v3180_v57, %v1191_v21  ;;  %v1229_v16 = vrot.slane %v3237_v47, 5  ;;  %vm4484_vm4 = vmmov %vm4471_vm7 }
 0x122   : > { %v3389_v48 = vmul.f32 %v4470_v45, %v976_v7  ;;  %v1076_v13 = vmul.f32 %v4470_v45, %v977_v36  ;;  %v1205_v43 = vmax.f32 %v3159_v11, %v1185_v0  ;;  %v1207_v50 = vmax.f32 %v3155_v30, %v1187_v40  ;;  %v4473_v7 = vld [vmem:[#allocation23_spill] sm:$0xff]  ;;  %vm4485_vm5 = vmmov %vm4484_vm4 }
 0x123   : > { %v1264_v33 = vrot.slane %v3386_v27, 3  ;;  %v793_v61 = vsel %vm4471_vm7, %v761_v37, %v781_v8  ;;  %v803_v57 = vsel %vm4472_vm10, %v781_v8, %v761_v37  ;;  %v1263_v51 = vrot.slane %v3269_v52, 3  ;;  %vm4486_vm6 = vmmov %vm4484_vm4 }
 0x124   : > { %v3401_v21 = vmul.f32 %v2813_v46, %v1076_v13  ;;  %v1115_v20 = vrot.slane %v3389_v48, 7  ;;  %v1155_v38 = vrot.slane %v3389_v48, 1  ;;  %v1225_v11 = vrot.slane %v1205_v43, 5  ;;  %v680_v31 = vpop.permute.xlu1 %679  ;;  %v637_v30 = vpop.permute.xlu0 %636  ;;  %vm4487_vm7 = vmmov %vm4484_vm4 }
 0x125   : > { %v1227_v58 = vrot.slane %v1207_v50, 5  ;;  %v1260_v35 = vrot.slane %v1207_v50, 3  ;;  %v1291_v2 = vsel %vm1278_vm9, %v1262_v28, %v1264_v33  ;;  %v3410_v36 = vadd.f32 %v4473_v7, %v803_v57  ;;  %v4478_v7 = vld [vmem:[#allocation24_spill] sm:$0xff]  ;;  %vm4488_vm10 = vmmov %vm4476_vm0 }
 0x126   : > { %v1116_v8 = vrot.slane %v3401_v21, 7  ;;  %v3419_v37 = vsel %vm4474_vm11, %v1113_v6, %v1115_v20  ;;  %v4377_v0 = vrot.slane %v3401_v21, 1  ;;  %v1173_v40 = vsel %vm4475_vm14, %v1153_v14, %v1155_v38  ;;  %vm4489_vm11 = vmmov %vm4481_vm2 }
 0x127   : > { %v1193_v45 = vmax.f32 %v3315_v49, %v1173_v40  ;;  %v1258_v13 = vsel %vm1243_vm1, %v1225_v11, %v1227_v58  ;;  %v1293_v43 = vsel %vm1278_vm9, %v1260_v35, %v1262_v28  ;;  %v1256_v6 = vsel %vm1243_vm1, %v1227_v58, %v1229_v16  ;;  %vm4492_vm14 = vmmov %vm4476_vm0 }
 0x128   : > { %v3441_v57 = vsel %vm4476_vm0, %v1114_v32, %v1116_v8  ;;  %v3447_v14 = vsel %vm4477_vm12, %v1154_v26, %v4377_v0  ;;  %v1295_v49 = vmax.f32 %v1258_v13, %v1293_v43  ;;  %v1297_v11 = vmax.f32 %v1256_v6, %v1291_v2  ;;  %v3449_v28 = vpop.permute.xlu1 %762  ;;  %v700_v35 = vpop.permute.xlu0 %699  ;;  %vm4494_vm0 = vmmov %vm4481_vm2 }
 0x129   : > { %v3452_v40 = vadd.f32 %v4478_v7, %v793_v61  ;;  %v1142_v32 = vsel %vm4479_vm13, %v1106_v24, %v1108_v12  ;;  %v1144_v26 = vsel %vm4480_vm15, %v4374_v42, %v1106_v24  ;;  %v1180_v61 = vsel %vm4481_vm2, %v1148_v1, %v1150_v3  ;;  %vm4497_vm12 = vmmov %vm4484_vm4 }
 0x12a   : > { %v3472_v58 = vmax.f32 %v1207_v50, %v1295_v49  ;;  %v3475_v2 = vmax.f32 %v3237_v47, %v1297_v11  ;;  %v1182_v12 = vsel %vm4482_vm3, %v4375_v23, %v1148_v1  ;;  %v1188_v24 = vmax.f32 %v1142_v32, %v1180_v61  ;;  %vm4498_vm13 = vmmov %vm4484_vm4 }
 0x12b   : > { %v1186_v13 = vmax.f32 %v1144_v26, %v1182_v12  ;;  %v1192_v43 = vmax.f32 %v3260_v39, %v3366_v19  ;;  %v4376_v3 = vrot.slane %v3269_v52, 5  ;;  %v892_v1 = vsel %vm644_vm8, %v859_v18, %v879_v22  ;;  %v4483_v12 = vld [vmem:[#allocation9_spill] sm:$0xff]  ;;  %vm4499_vm15 = vmmov %vm4488_vm10 }
 0x12c   : > { %1327 = vrot.lane.b32.xlu0 %v3472_v58, %s2072_s11  ;;  %1329 = vrot.lane.b32.xlu1 %v3475_v2, %s2072_s11  ;;  %v1208_v50 = vmax.f32 %v3167_v60, %v1188_v24  ;;  %v902_v6 = vsel %vm644_vm8, %v879_v22, %v859_v18  ;;  %v3496_v49 = vpop.permute.xlu1 %860  ;;  %v1231_v39 = vrot.slane %v3386_v27, 5  ;;  %v783_v19 = vpop.permute.xlu0 %782  ;;  %v918_v32 = vadd.f32 %v892_v1, %v3301_v34  ;;  %vm4500_vm2 = vmmov %vm4494_vm0 }
 0x12d   : > { %v1206_v11 = vmax.f32 %v3172_v17, %v1186_v13  ;;  %v3501_v7 = vmax.f32 %v3194_v44, %v1192_v43  ;;  %v919_v60 = vadd.f32 %v902_v6, %v3304_v55  ;;  %v652_v22 = vsel %vm644_vm8, %v4483_v12, %v637_v30  ;;  %vm4501_vm3 = vmmov %vm4488_vm10 }
 0x12e   : > { %v1228_v26 = vrot.slane %v1208_v50, 5  ;;  %v1261_v61 = vrot.slane %v1208_v50, 3  ;;  %v662_v18 = vsel %vm644_vm8, %v637_v30, %v4483_v12  ;;  %v958_v42 = vand.u32 2147483647, %v918_v32 }
 0x12f   : > { %v1226_v24 = vrot.slane %v1206_v11, 5  ;;  %v1265_v13 = vrot.slane %v3501_v7, 3  ;;  %v959_v44 = vand.u32 2147483647, %v919_v60  ;;  %v713_v43 = vsel %vm4484_vm4, %v680_v31, %v700_v35  ;;  %vm4502_vm4 = vmmov %vm4494_vm0 }
 0x130   : > { %v1294_v34 = vsel %vm1278_vm9, %v1261_v61, %v1263_v51  ;;  %v1257_v55 = vsel %vm1243_vm1, %v1228_v26, %v4376_v3  ;;  %v723_v1 = vsel %vm4485_vm5, %v700_v35, %v680_v31  ;;  %v639_v30 = vpop.permute.xlu1 %638  ;;  %v881_v6 = vpop.permute.xlu0 %880  ;;  %v978_v60 = vadd.f32 %v958_v42, %v3380_v25  ;;  %vm4505_vm5 = vmmov %vm4494_vm0 }
 0x131   : > { %v1259_v11 = vsel %vm1243_vm1, %v1226_v24, %v1228_v26  ;;  %v1292_v32 = vsel %vm1278_vm9, %v1263_v51, %v1265_v13  ;;  %v979_v61 = vadd.f32 %v959_v44, %v3382_v63  ;;  %v740_v3 = vsub.f32 %v652_v22, %v723_v1 }
 0x132   : > { %v1296_v12 = vmax.f32 %v1259_v11, %v1294_v34  ;;  %v1298_v23 = vmax.f32 %v1257_v55, %v1292_v32  ;;  %v741_v0 = vsub.f32 %v662_v18, %v713_v43  ;;  %v3531_v31 = vmul.f32 %v2925_v9, %v978_v60  ;;  %v4496_v60 = vld [vmem:[#allocation12_spill] sm:$0xff] }
 0x133   : > { %v1078_v35 = vmul.f32 %v2925_v9, %v979_v61  ;;  %v3535_v26 = vmax.f32 %v3281_v59, %v1193_v45  ;;  %v1254_v42 = vsel %vm1243_vm1, %v1229_v16, %v1231_v39  ;;  %v940_v51 = vand.u32 2147483647, %v740_v3 }
 0x134   : > { %v3543_v25 = vmax.f32 %v1208_v50, %v1296_v12  ;;  %v3546_v63 = vmax.f32 %v3269_v52, %v1298_v23  ;;  %v941_v22 = vand.u32 2147483647, %v741_v0  ;;  %v1117_v9 = vrot.slane %v3531_v31, 7  ;;  %v702_v3 = vpop.permute.xlu1 %701  ;;  %v682_v50 = vpop.permute.xlu0 %681 }
 0x135   : > { %v3549_v18 = vmul.f32 %v2813_v46, %v1078_v35  ;;  %v1157_v59 = vrot.slane %v3531_v31, 1  ;;  %v1266_v45 = vrot.slane %v3535_v26, 3  ;;  %v794_v23 = vsel %vm4486_vm6, %v3449_v28, %v783_v19  ;;  %vm4507_vm6 = vmmov %vm4501_vm3 }
 0x136   : > { %1343 = vrot.lane.b32.xlu0 %v3543_v25, %s2072_s11  ;;  %1345 = vrot.lane.b32.xlu1 %v3546_v63, %s2072_s11  ;;  %v804_v47 = vsel %vm4487_vm7, %v783_v19, %v3449_v28  ;;  %v1194_v16 = vmax.f32 %v3360_v41, %v3447_v14  ;;  %v1232_v0 = vrot.slane %v3501_v7, 5  ;;  %v3574_v44 = vsel %vm4488_vm10, %v1115_v20, %v1117_v9  ;;  %v4490_v19 = vld [vmem:[#allocation25_spill] sm:$0xff]  ;;  %v4491_v20 = vld [vmem:[#allocation26_spill] sm:$0xff]  ;;  %vm4508_vm7 = vmmov %vm4501_vm3 }
 0x137   : > { %v1118_v24 = vrot.slane %v3549_v18, 7  ;;  %v1158_v34 = vrot.slane %v3549_v18, 1  ;;  %v1171_v41 = vsel %vm4489_vm11, %v1155_v38, %v1157_v59  ;;  %v1289_v28 = vsel %vm1278_vm9, %v1264_v33, %v1266_v45  ;;  %vm4510_vm10 = vmmov %vm4494_vm0 }
 0x138   : > { %v1195_v14 = vmax.f32 %v3419_v37, %v1171_v41  ;;  %v842_v55 = vadd.f32 %v4490_v19, %v804_v47  ;;  %v843_v43 = vadd.f32 %v4491_v20, %v794_v23  ;;  %v4493_v38 = vrot.slane %v3401_v21, 1  ;;  %v863_v19 = vpop.permute.xlu0 %862  ;;  %vm4511_vm11 = vmmov %vm4494_vm0 }
 0x139   : > { %v3596_v1 = vsel %vm4492_vm14, %v1116_v8, %v1118_v24  ;;  %v1299_v33 = vmax.f32 %v1254_v42, %v1289_v28  ;;  %v3605_v11 = vmax.f32 %v3307_v5, %v1194_v16  ;;  %v4495_v8 = vrot.slane %v3269_v52, 5  ;;  %v883_v28 = vpop.permute.xlu1 %882  ;;  %vm4513_vm14 = vmmov %vm4501_vm3 }
 0x13a   : > { %v1172_v37 = vsel %vm4494_vm0, %v4493_v38, %v1158_v34  ;;  %1375 = vrot.lane.b32.xlu0 %v3472_v58, %s2071_s10  ;;  %1377 = vrot.lane.b32.xlu1 %v3475_v2, %s2071_s10  ;;  %v653_v61 = vsel %vm644_vm8, %v4496_v60, %v639_v30  ;;  %v663_v5 = vsel %vm644_vm8, %v639_v30, %v4496_v60  ;;  %v1233_v12 = vrot.slane %v3535_v26, 5  ;;  %vm4514_vm0 = vmmov %vm4501_vm3 }
 0x13b   : > { %v1255_v32 = vsel %vm1243_vm1, %v4495_v8, %v1232_v0  ;;  %v3625_v35 = vmax.f32 %v3386_v27, %v1299_v33  ;;  %v1267_v42 = vrot.slane %v3605_v11, 3  ;;  %v893_v52 = vsel %vm644_vm8, %v3496_v49, %v881_v6 }
 0x13c   : > { %v903_v23 = vsel %vm644_vm8, %v881_v6, %v3496_v49  ;;  %v920_v47 = vadd.f32 %v893_v52, %v3410_v36  ;;  %v714_v30 = vsel %vm4497_vm12, %v682_v50, %v702_v3  ;;  %v724_v41 = vsel %vm4498_vm13, %v702_v3, %v682_v50  ;;  %vm4516_vm12 = vmmov %vm4500_vm2 }
 0x13d   : > { %v921_v16 = vadd.f32 %v903_v23, %v3452_v40  ;;  %v1290_v20 = vsel %vm1278_vm9, %v1265_v13, %v1267_v42  ;;  %v742_v38 = vsub.f32 %v653_v61, %v724_v41  ;;  %v743_v33 = vsub.f32 %v663_v5, %v714_v30  ;;  %vm4517_vm13 = vmmov %vm4500_vm2 }
 0x13e   : > { %v3645_v49 = vmax.f32 %v3389_v48, %v1195_v14  ;;  %1391 = vrot.lane.b32.xlu0 %v3543_v25, %s2071_s10  ;;  %1393 = vrot.lane.b32.xlu1 %v3546_v63, %s2071_s10  ;;  %v1300_v36 = vmax.f32 %v1255_v32, %v1290_v20  ;;  %v960_v40 = vand.u32 2147483647, %v920_v47  ;;  %v1252_v13 = vsel %vm1243_vm1, %v1231_v39, %v1233_v12 }
 0x13f   : > { %v961_v6 = vand.u32 2147483647, %v921_v16  ;;  %v942_v3 = vand.u32 2147483647, %v742_v38  ;;  %v943_v50 = vand.u32 2147483647, %v743_v33  ;;  %v894_v14 = vsel %vm644_vm8, %v863_v19, %v883_v28 }
 0x140   : > { %v1268_v48 = vrot.slane %v3645_v49, 3  ;;  %v3661_v8 = vmax.f32 %v3501_v7, %v1300_v36  ;;  %v980_v32 = vadd.f32 %v960_v40, %v940_v51  ;;  %v904_v61 = vsel %vm644_vm8, %v883_v28, %v863_v19 }
 0x141   : > { %v981_v60 = vadd.f32 %v961_v6, %v941_v22  ;;  %v922_v39 = vadd.f32 %v894_v14, %v842_v55  ;;  %v923_v5 = vadd.f32 %v904_v61, %v843_v43  ;;  %v1196_v52 = vmax.f32 %v3441_v57, %v1172_v37 }
 0x142   : > { %v1287_v27 = vsel %vm1278_vm9, %v1266_v45, %v1268_v48  ;;  %1331 = vrot.lane.b32.xlu0 %v3625_v35, %s2072_s11  ;;  %1347 = vrot.lane.b32.xlu1 %v3661_v8, %s2072_s11  ;;  %v1079_v51 = vmul.f32 %v3099_v53, %v980_v32  ;;  %v1234_v47 = vrot.slane %v3605_v11, 5  ;;  %v1235_v57 = vrot.slane %v3645_v49, 5 }
 0x143   : > { %v1080_v22 = vmul.f32 %v3099_v53, %v981_v60  ;;  %v1301_v23 = vmax.f32 %v1252_v13, %v1287_v27  ;;  %v962_v16 = vand.u32 2147483647, %v922_v39  ;;  %v963_v30 = vand.u32 2147483647, %v923_v5 }
 0x144   : > { %v3678_v45 = vmax.f32 %v3401_v21, %v1196_v52  ;;  %v1119_v43 = vrot.slane %v1079_v51, 7  ;;  %v1159_v37 = vrot.slane %v1079_v51, 1  ;;  %v1253_v53 = vsel %vm1243_vm1, %v1232_v0, %v1234_v47 }
 0x145   : > { %v1100_v55 = vmul.f32 %v2813_v46, %v1080_v22  ;;  %v3683_v41 = vmax.f32 %v3535_v26, %v1301_v23  ;;  %v982_v28 = vadd.f32 %v962_v16, %v942_v3  ;;  %v983_v19 = vadd.f32 %v963_v30, %v943_v50 }
 0x146   : > { %v1269_v20 = vrot.slane %v3678_v45, 3  ;;  %1379 = vrot.lane.b32.xlu0 %v3625_v35, %s2071_s10  ;;  %v1129_v38 = vsel %vm4499_vm15, %v1117_v9, %v1119_v43  ;;  %v1169_v7 = vsel %vm4500_vm2, %v1157_v59, %v1159_v37  ;;  %1395 = vrot.lane.b32.xlu1 %v3661_v8, %s2071_s10  ;;  %v4503_v14 = vrot.slane %v3172_v17, 1 }
 0x147   : > { %v1120_v21 = vrot.slane %v1100_v55, 7  ;;  %v1160_v33 = vrot.slane %v1100_v55, 1  ;;  %v1197_v0 = vmax.f32 %v3574_v44, %v1169_v7  ;;  %v1081_v36 = vmul.f32 %v3102_v4, %v982_v28 }
 0x148   : > { %v1082_v40 = vmul.f32 %v3102_v4, %v983_v19  ;;  %v1288_v6 = vsel %vm1278_vm9, %v1267_v42, %v1269_v20  ;;  %v1250_v44 = vsel %vm1243_vm1, %v1233_v12, %v1235_v57  ;;  %v4509_v27 = vrot.slane %v3241_v54, 1 }
 0x149   : > { %v1130_v9 = vsel %vm4501_vm3, %v1118_v24, %v1120_v21  ;;  %v1170_v59 = vsel %vm4502_vm4, %v1158_v34, %v1160_v33  ;;  %v1302_v13 = vmax.f32 %v1253_v53, %v1288_v6  ;;  %v1121_v3 = vrot.slane %v1081_v36, 7 }
 0x14a   : > { %v1102_v4 = vmul.f32 %v2813_v46, %v1082_v40  ;;  %v1161_v42 = vrot.slane %v1081_v36, 1  ;;  %v1217_v50 = vmax.f32 %v3531_v31, %v1197_v0  ;;  %v4504_v24 = vrot.slane %v3272_v56, 1  ;;  %1333 = vrot.lane.b32.xlu0 %v3683_v41, %s2072_s11 }
 0x14b   : > { %v3732_v26 = vmax.f32 %v3605_v11, %v1302_v13  ;;  %v1198_v46 = vmax.f32 %v3596_v1, %v1170_v59  ;;  %v1236_v34 = vrot.slane %v3678_v45, 5  ;;  %v4506_v31 = vrot.slane %v3241_v54, 7 }
 0x14c   : > { %v3727_v32 = vsel %vm4505_vm5, %v4504_v24, %v4503_v14  ;;  %v1122_v12 = vrot.slane %v1102_v4, 7  ;;  %v1127_v60 = vsel %vm4508_vm7, %v1119_v43, %v1121_v3  ;;  %v1162_v61 = vrot.slane %v1102_v4, 1 }
 0x14d   : > { %v1125_v17 = vsel %vm4507_vm6, %v1121_v3, %v4506_v31  ;;  %v1165_v11 = vsel %vm4510_vm10, %v1161_v42, %v4509_v27  ;;  %v1167_v1 = vsel %vm4511_vm11, %v1159_v37, %v1161_v42  ;;  %1349 = vrot.lane.b32.xlu1 %v3732_v26, %s2072_s11  ;;  %v1270_v5 = vrot.slane %v1217_v50, 3 }
 0x14e   : > { %v1203_v39 = vmax.f32 %v1125_v17, %v3290_v15  ;;  %v4512_v52 = vrot.slane %v3272_v56, 7  ;;  %v1128_v23 = vsel %vm4514_vm0, %v1120_v21, %v1122_v12  ;;  %v4515_v16 = vmov %v4504_v24  ;;  %1381 = vrot.lane.b32.xlu0 %v3683_v41, %s2071_s10 }
 0x14f   : > { %v1166_v30 = vsel %vm4516_vm12, %v1162_v61, %v4515_v16  ;;  %v1168_v15 = vsel %vm4517_vm13, %v1160_v33, %v1162_v61  ;;  %v1199_v43 = vmax.f32 %v1129_v38, %v1167_v1  ;;  %v1201_v28 = vmax.f32 %v1127_v60, %v1165_v11 }
 0x150   : > { %v1126_v22 = vsel %vm4513_vm14, %v1122_v12, %v4512_v52  ;;  %v1200_v37 = vmax.f32 %v1130_v9, %v1168_v15  ;;  %v1202_v19 = vmax.f32 %v1128_v23, %v1166_v30  ;;  %v1285_v53 = vsel %vm1278_vm9, %v1268_v48, %v1270_v5 }
 0x151   : > { %v1218_v21 = vmax.f32 %v3549_v18, %v1198_v46  ;;  %v1251_v7 = vsel %vm1243_vm1, %v1234_v47, %v1236_v34  ;;  %v1237_v0 = vrot.slane %v1217_v50, 5  ;;  %v1219_v40 = vmax.f32 %v1079_v51, %v1199_v43  ;;  %1397 = vrot.lane.b32.xlu1 %v3732_v26, %s2071_s10 }
 0x152   : > { %v1221_v33 = vmax.f32 %v1081_v36, %v1201_v28  ;;  %v1222_v38 = vmax.f32 %v1102_v4, %v1202_v19  ;;  %v1303_v6 = vmax.f32 %v1250_v44, %v1285_v53  ;;  %v1220_v13 = vmax.f32 %v1100_v55, %v1200_v37 }
 0x153   : > { %v1271_v9 = vrot.slane %v1218_v21, 3  ;;  %v1248_v59 = vsel %vm1243_vm1, %v1235_v57, %v1237_v0  ;;  %v1238_v3 = vrot.slane %v1218_v21, 5  ;;  %v1272_v18 = vrot.slane %v1219_v40, 3 }
 0x154   : > { %v3777_v48 = vmax.f32 %v3645_v49, %v1303_v6  ;;  %v1239_v42 = vrot.slane %v1219_v40, 5  ;;  %v1274_v47 = vrot.slane %v1221_v33, 3  ;;  %v1273_v4 = vrot.slane %v1220_v13, 3 }
 0x155   : > { %v1286_v51 = vsel %vm1278_vm9, %v1269_v20, %v1271_v9  ;;  %v1249_v36 = vsel %vm1243_vm1, %v1236_v34, %v1238_v3  ;;  %v1240_v44 = vrot.slane %v1220_v13, 5  ;;  %v1283_v55 = vsel %vm1278_vm9, %v1270_v5, %v1272_v18 }
 0x156   : > { %1335 = vrot.lane.b32.xlu0 %v3777_v48, %s2072_s11  ;;  %v1304_v57 = vmax.f32 %v1251_v7, %v1286_v51  ;;  %v1246_v49 = vsel %vm1243_vm1, %v1237_v0, %v1239_v42  ;;  %v1281_v14 = vsel %vm1278_vm9, %v1272_v18, %v1274_v47  ;;  %v1305_v24 = vmax.f32 %v1248_v59, %v1283_v55 }
 0x157   : > { %v1284_v20 = vsel %vm1278_vm9, %v1271_v9, %v1273_v4  ;;  %v1307_v46 = vmax.f32 %v1246_v49, %v1281_v14  ;;  %v1247_v34 = vsel %vm1243_vm1, %v1238_v3, %v1240_v44  ;;  %v1275_v17 = vrot.slane %v1222_v38, 3 }
 0x158   : > { %v3796_v12 = vmax.f32 %v3678_v45, %v1304_v57  ;;  %v1306_v31 = vmax.f32 %v1249_v36, %v1284_v20  ;;  %v1223_v60 = vmax.f32 %v3241_v54, %v1203_v39  ;;  %v3799_v61 = vmax.f32 %v1217_v50, %v1305_v24 }
 0x159   : > { %v3801_v27 = vmax.f32 %v1219_v40, %v1307_v46  ;;  %v1241_v11 = vrot.slane %v1221_v33, 5  ;;  %v1204_v1 = vmax.f32 %v1126_v22, %v3727_v32  ;;  %v1282_v45 = vsel %vm1278_vm9, %v1273_v4, %v1275_v17 }
 0x15a   : > { %1351 = vrot.lane.b32.xlu1 %v3796_v12, %s2072_s11  ;;  %1383 = vrot.lane.b32.xlu0 %v3777_v48, %s2071_s10  ;;  %v3808_v5 = vmax.f32 %v1218_v21, %v1306_v31  ;;  %v1276_v52 = vrot.slane %v1223_v60, 3  ;;  %v1242_v54 = vrot.slane %v1222_v38, 5  ;;  %v1308_v50 = vmax.f32 %v1247_v34, %v1282_v45 }
 0x15b   : > { %v1244_v39 = vsel %vm1243_vm1, %v1239_v42, %v1241_v11  ;;  %v1224_v23 = vmax.f32 %v3272_v56, %v1204_v1 }
 0x15c   : > { %v1279_v32 = vsel %vm1278_vm9, %v1274_v47, %v1276_v52  ;;  %v1245_v22 = vsel %vm1243_vm1, %v1240_v44, %v1242_v54  ;;  %v3819_v16 = vmax.f32 %v1220_v13, %v1308_v50  ;;  %vm4518_vm1 = vcmp.lt.s32.totalorder %v2721_v62, 1 }
 0x15d   : > { %v1309_v30 = vmax.f32 %v1244_v39, %v1279_v32  ;;  %v1277_v15 = vrot.slane %v1224_v23, 3  ;;  %vm4520_vm15 = vmmov %vm4518_vm1 }
 0x15e   : > { %1399 = vrot.lane.b32.xlu1 %v3796_v12, %s2071_s10  ;;  %1337 = vrot.lane.b32.xlu0 %v3799_v61, %s2072_s11  ;;  %vm4521_vm2 = vmmov %vm4518_vm1 }
 0x15f   : > { %v3825_v43 = vmax.f32 %v1221_v33, %v1309_v30  ;;  %v1280_v56 = vsel %vm1278_vm9, %v1275_v17, %v1277_v15  ;;  %vm4519_vm9 = vmmov %vm4518_vm1 }
 0x160   : > { %v1310_v37 = vmax.f32 %v1245_v22, %v1280_v56  ;;  %vm4522_vm3 = vmmov %vm4518_vm1 }
 0x161   : > { %vm4523_vm4 = vmmov %vm4518_vm1 }
 0x162   : > { %1353 = vrot.lane.b32.xlu1 %v3808_v5, %s2072_s11  ;;  %1385 = vrot.lane.b32.xlu0 %v3799_v61, %s2071_s10  ;;  %v3833_v28 = vmax.f32 %v1222_v38, %v1310_v37  ;;  %vm4524_vm5 = vmmov %vm4518_vm1 }
 0x163   : > { %vm4525_vm6 = vmmov %vm4518_vm1 }
 0x164   : > { %vm4526_vm7 = vmmov %vm4518_vm1 }
 0x165   : > { %vm4527_vm10 = vmmov %vm4518_vm1 }
 0x166   : > { %1401 = vrot.lane.b32.xlu1 %v3808_v5, %s2071_s10  ;;  %1339 = vrot.lane.b32.xlu0 %v3801_v27, %s2072_s11  ;;  %vm4528_vm11 = vmmov %vm4518_vm1 }
 0x167   : > { %vm4529_vm14 = vmmov %vm4518_vm1 }
 0x168   : > { %vm4530_vm0 = vmmov %vm4518_vm1 }
 0x169   : > { %vm4531_vm12 = vmmov %vm4530_vm0 }
 0x16a   : > { %1355 = vrot.lane.b32.xlu1 %v3819_v16, %s2072_s11  ;;  %1387 = vrot.lane.b32.xlu0 %v3801_v27, %s2071_s10  ;;  %vm4532_vm13 = vmmov %vm4530_vm0 }
 0x16e   : > { %1403 = vrot.lane.b32.xlu1 %v3819_v16, %s2071_s10  ;;  %1341 = vrot.lane.b32.xlu0 %v3825_v43, %s2072_s11 }
 0x172   : > { %1357 = vrot.lane.b32.xlu1 %v3833_v28, %s2072_s11  ;;  %1389 = vrot.lane.b32.xlu0 %v3825_v43, %s2071_s10 }
 0x176   : > { %1405 = vrot.lane.b32.xlu1 %v3833_v28, %s2071_s10 }
 0x19e   : > { %v1330_v29 = vpop.permute.xlu1 %1329  ;;  %v1328_v19 = vpop.permute.xlu0 %1327 }
 0x1a8   : > { %v1346_v53 = vpop.permute.xlu1 %1345  ;;  %v1344_v21 = vpop.permute.xlu0 %1343 }
 0x1a9   : > { %v1368_v40 = vsel %vm4518_vm1, %v1346_v53, %v1330_v29  ;;  %v1367_v33 = vsel %vm4519_vm9, %v1344_v21, %v1328_v19  ;;  %v1360_v47 = vsel %vm4520_vm15, %v1330_v29, %v1346_v53  ;;  %v1359_v51 = vsel %vm4521_vm2, %v1328_v19, %v1344_v21  ;;  %vm4533_vm1 = vmmov %vm4530_vm0 }
 0x1aa   : > { %vm1487_vm9 = vcmp.lt.s32.totalorder %v2721_v62, 3 }
 0x1ac   : > { %v1378_v7 = vpop.permute.xlu1 %1377  ;;  %v1376_v0 = vpop.permute.xlu0 %1375 }
 0x1b0   : > { %v1394_v38 = vpop.permute.xlu1 %1393  ;;  %v1392_v6 = vpop.permute.xlu0 %1391 }
 0x1b1   : > { %v1408_v9 = vsel %vm644_vm8, %v1378_v7, %v1394_v38  ;;  %v1416_v59 = vsel %vm644_vm8, %v1394_v38, %v1378_v7  ;;  %v1407_v13 = vsel %vm644_vm8, %v1376_v0, %v1392_v6  ;;  %v1415_v3 = vsel %vm644_vm8, %v1392_v6, %v1376_v0 }
 0x1b2   : > { %v1425_v18 = vmax.f32 %v1368_v40, %v1408_v9  ;;  %v1423_v42 = vmax.f32 %v1367_v33, %v1407_v13  ;;  %v1426_v36 = vmax.f32 %v1360_v47, %v1416_v59  ;;  %v1424_v44 = vmax.f32 %v1359_v51, %v1415_v3 }
 0x1b4   : > { %v3870_v4 = vmax.f32 %v3475_v2, %v1425_v18  ;;  %v3873_v57 = vmax.f32 %v3472_v58, %v1423_v42  ;;  %v1332_v55 = vpop.permute.xlu0 %1331  ;;  %v1348_v49 = vpop.permute.xlu1 %1347  ;;  %v3880_v14 = vmax.f32 %v3546_v63, %v1426_v36  ;;  %v3883_v24 = vmax.f32 %v3543_v25, %v1424_v44 }
 0x1b5   : > { %v1361_v63 = vsel %vm4522_vm3, %v1332_v55, %v1348_v49  ;;  %v1369_v31 = vsel %vm4523_vm4, %v1348_v49, %v1332_v55 }
 0x1b6   : > { %1457 = vrot.lane.b32.xlu1 %v3870_v4, %s2073_s12  ;;  %1455 = vrot.lane.b32.xlu0 %v3873_v57, %s2073_s12 }
 0x1b8   : > { %v1380_v2 = vpop.permute.xlu0 %1379  ;;  %v1396_v20 = vpop.permute.xlu1 %1395 }
 0x1b9   : > { %v1409_v46 = vsel %vm644_vm8, %v1380_v2, %v1396_v20  ;;  %v1417_v34 = vsel %vm644_vm8, %v1396_v20, %v1380_v2 }
 0x1ba   : > { %1473 = vrot.lane.b32.xlu1 %v3880_v14, %s2073_s12  ;;  %1471 = vrot.lane.b32.xlu0 %v3883_v24, %s2073_s12  ;;  %v1427_v17 = vmax.f32 %v1369_v31, %v1409_v46  ;;  %v1428_v60 = vmax.f32 %v1361_v63, %v1417_v34 }
 0x1bc   : > { %v1334_v58 = vpop.permute.xlu0 %1333  ;;  %v3906_v45 = vmax.f32 %v3625_v35, %v1427_v17  ;;  %v3909_v52 = vmax.f32 %v3661_v8, %v1428_v60 }
 0x1be   : > { %1506 = vrot.lane.b32.xlu1 %v3870_v4, %s2074_s17  ;;  %1504 = vrot.lane.b32.xlu0 %v3873_v57, %s2074_s17 }
 0x1bf   : > { %v1350_v25 = vpop.permute.xlu1 %1349 }
 0x1c0   : > { %v1382_v11 = vpop.permute.xlu0 %1381  ;;  %v1362_v35 = vsel %vm4524_vm5, %v1334_v58, %v1350_v25  ;;  %v1370_v8 = vsel %vm4525_vm6, %v1350_v25, %v1334_v58 }
 0x1c2   : > { %1522 = vrot.lane.b32.xlu1 %v3880_v14, %s2074_s17  ;;  %1520 = vrot.lane.b32.xlu0 %v3883_v24, %s2074_s17 }
 0x1c3   : > { %v1398_v1 = vpop.permute.xlu1 %1397 }
 0x1c4   : > { %v1410_v54 = vsel %vm644_vm8, %v1382_v11, %v1398_v1  ;;  %v1418_v50 = vsel %vm644_vm8, %v1398_v1, %v1382_v11 }
 0x1c5   : > { %v1429_v23 = vmax.f32 %v1370_v8, %v1410_v54  ;;  %v1430_v32 = vmax.f32 %v1362_v35, %v1418_v50 }
 0x1c6   : > { %1475 = vrot.lane.b32.xlu1 %v3909_v52, %s2073_s12  ;;  %1459 = vrot.lane.b32.xlu0 %v3906_v45, %s2073_s12 }
 0x1c7   : > { %v3928_v15 = vmax.f32 %v3683_v41, %v1429_v23  ;;  %v3931_v56 = vmax.f32 %v3732_v26, %v1430_v32 }
 0x1c8   : > { %v1336_v39 = vpop.permute.xlu0 %1335 }
 0x1ca   : > { %1524 = vrot.lane.b32.xlu1 %v3909_v52, %s2074_s17  ;;  %1508 = vrot.lane.b32.xlu0 %v3906_v45, %s2074_s17 }
 0x1cc   : > { %v1352_v22 = vpop.permute.xlu1 %1351  ;;  %v1384_v30 = vpop.permute.xlu0 %1383 }
 0x1cd   : > { %v1363_v19 = vsel %vm4526_vm7, %v1336_v39, %v1352_v22  ;;  %v1371_v53 = vsel %vm4527_vm10, %v1352_v22, %v1336_v39 }
 0x1ce   : > { %1477 = vrot.lane.b32.xlu1 %v3931_v56, %s2073_s12  ;;  %1461 = vrot.lane.b32.xlu0 %v3928_v15, %s2073_s12 }
 0x1d0   : > { %v1400_v37 = vpop.permute.xlu1 %1399  ;;  %v1338_v29 = vpop.permute.xlu0 %1337 }
 0x1d1   : > { %v1411_v41 = vsel %vm644_vm8, %v1384_v30, %v1400_v37  ;;  %v1419_v26 = vsel %vm644_vm8, %v1400_v37, %v1384_v30 }
 0x1d2   : > { %v1431_v21 = vmax.f32 %v1371_v53, %v1411_v41  ;;  %v1432_v7 = vmax.f32 %v1363_v19, %v1419_v26  ;;  %1526 = vrot.lane.b32.xlu1 %v3931_v56, %s2074_s17  ;;  %1510 = vrot.lane.b32.xlu0 %v3928_v15, %s2074_s17  ;;  %v4030_v26 = vld [vmem:[%s2127_s27] sm:$0xff] }
 0x1d4   : > { %v3950_v0 = vmax.f32 %v3777_v48, %v1431_v21  ;;  %v3953_v40 = vmax.f32 %v3796_v12, %v1432_v7  ;;  %v1354_v33 = vpop.permute.xlu1 %1353  ;;  %v1386_v38 = vpop.permute.xlu0 %1385  ;;  %v4033_v21 = vld [vmem:[%s2127_s27 + $0x8] sm:$0xff]  ;;  %v1655_v7 = vunpack.c.1.s8 %v4030_v26 }
 0x1d5   : > { %v1364_v59 = vsel %vm4528_vm11, %v1338_v29, %v1354_v33  ;;  %v1372_v48 = vsel %vm4529_vm14, %v1354_v33, %v1338_v29  ;;  %v1656_v33 = vunpack.c.1.s8 %v4033_v21 }
 0x1d6   : > { %1479 = vrot.lane.b32.xlu1 %v3953_v40, %s2073_s12  ;;  %1463 = vrot.lane.b32.xlu0 %v3950_v0, %s2073_s12 }
 0x1d8   : > { %v1402_v6 = vpop.permute.xlu1 %1401  ;;  %v1340_v9 = vpop.permute.xlu0 %1339 }
 0x1d9   : > { %v1412_v12 = vsel %vm644_vm8, %v1386_v38, %v1402_v6  ;;  %v1420_v13 = vsel %vm644_vm8, %v1402_v6, %v1386_v38 }
 0x1da   : > { %v1433_v3 = vmax.f32 %v1372_v48, %v1412_v12  ;;  %v1434_v18 = vmax.f32 %v1364_v59, %v1420_v13  ;;  %1528 = vrot.lane.b32.xlu1 %v3953_v40, %s2074_s17  ;;  %1512 = vrot.lane.b32.xlu0 %v3950_v0, %s2074_s17  ;;  %v1654_v59 = vunpack.c.0.s8 %v4033_v21  ;;  %v4045_v13 = vand.u32 255, %v1655_v7 }
 0x1dc   : > { %v3968_v42 = vmax.f32 %v3799_v61, %v1433_v3  ;;  %v3971_v47 = vmax.f32 %v3808_v5, %v1434_v18  ;;  %v1356_v51 = vpop.permute.xlu1 %1355  ;;  %v1388_v36 = vpop.permute.xlu0 %1387  ;;  %v4047_v3 = vand.u32 255, %v1656_v33 }
 0x1dd   : > { %v1365_v61 = vsel %vm4530_vm0, %v1340_v9, %v1356_v51  ;;  %v1373_v5 = vsel %vm4531_vm12, %v1356_v51, %v1340_v9  ;;  %v1653_v9 = vunpack.c.0.s8 %v4030_v26 }
 0x1de   : > { %1481 = vrot.lane.b32.xlu1 %v3971_v47, %s2073_s12  ;;  %1465 = vrot.lane.b32.xlu0 %v3968_v42, %s2073_s12 }
 0x1e0   : > { %v1404_v44 = vpop.permute.xlu1 %1403  ;;  %v1342_v58 = vpop.permute.xlu0 %1341 }
 0x1e1   : > { %v1413_v55 = vsel %vm644_vm8, %v1388_v36, %v1404_v44  ;;  %v1421_v49 = vsel %vm644_vm8, %v1404_v44, %v1388_v36 }
 0x1e2   : > { %v1435_v2 = vmax.f32 %v1373_v5, %v1413_v55  ;;  %v1436_v20 = vmax.f32 %v1365_v61, %v1421_v49  ;;  %1530 = vrot.lane.b32.xlu1 %v3971_v47, %s2074_s17  ;;  %1514 = vrot.lane.b32.xlu0 %v3968_v42, %s2074_s17  ;;  %v4057_v61 = vand.u32 255, %v1653_v9  ;;  %v4059_v5 = vand.u32 255, %v1654_v59 }
 0x1e4   : > { %v3990_v46 = vmax.f32 %v3801_v27, %v1435_v2  ;;  %v3993_v34 = vmax.f32 %v3819_v16, %v1436_v20  ;;  %v1358_v25 = vpop.permute.xlu1 %1357  ;;  %v1390_v63 = vpop.permute.xlu0 %1389  ;;  %v1657_v2 = vunpack.c.2.s8 %v4030_v26  ;;  %v1658_v20 = vunpack.c.2.s8 %v4033_v21 }
 0x1e5   : > { %v1366_v27 = vsel %vm4532_vm13, %v1342_v58, %v1358_v25  ;;  %v1374_v16 = vsel %vm4533_vm1, %v1358_v25, %v1342_v58 }
 0x1e6   : > { %1483 = vrot.lane.b32.xlu1 %v3993_v34, %s2073_s12  ;;  %1467 = vrot.lane.b32.xlu0 %v3990_v46, %s2073_s12  ;;  %v4095_v9 = vand.u32 255, %v1657_v2  ;;  %v4097_v59 = vand.u32 255, %v1658_v20 }
 0x1e8   : > { %v1406_v31 = vpop.permute.xlu1 %1405 }
 0x1e9   : > { %v1414_v17 = vsel %vm644_vm8, %v1390_v63, %v1406_v31  ;;  %v1422_v60 = vsel %vm644_vm8, %v1406_v31, %v1390_v63  ;;  %vm1536_vm8 = vcmp.lt.s32.totalorder %v2721_v62, 125 }
 0x1ea   : > { %v1437_v11 = vmax.f32 %v1374_v16, %v1414_v17  ;;  %v1438_v1 = vmax.f32 %v1366_v27, %v1422_v60  ;;  %1532 = vrot.lane.b32.xlu1 %v3993_v34, %s2074_s17  ;;  %1516 = vrot.lane.b32.xlu0 %v3990_v46, %s2074_s17  ;;  %v4072_v27 = vld [vmem:[%s2122_s23 + $0x10] sm:$0xff]  ;;  %v4075_v16 = vld [vmem:[%s2122_s23] sm:$0xff]  ;;  %v1687_v60 = vcvt.s32.f32 %v4045_v13 }
 0x1eb   : > { %v4078_v17 = vld [vmem:[%s2122_s23 + $0x18] sm:$0xff] }
 0x1ec   : > { %v4012_v54 = vmax.f32 %v3825_v43, %v1437_v11  ;;  %v4015_v50 = vmax.f32 %v3833_v28, %v1438_v1 }
 0x1ee   : > { %1485 = vrot.lane.b32.xlu1 %v4015_v50, %s2073_s12  ;;  %1469 = vrot.lane.b32.xlu0 %v4012_v54, %s2073_s12 }
 0x1f2   : > { %1534 = vrot.lane.b32.xlu1 %v4015_v50, %s2074_s17  ;;  %1518 = vrot.lane.b32.xlu0 %v4012_v54, %s2074_s17 }
 0x228   : > { %v1458_v43 = vpop.permute.xlu1 %1457  ;;  %v1456_v28 = vpop.permute.xlu0 %1455 }
 0x22c   : > { %v1474_v39 = vpop.permute.xlu1 %1473  ;;  %v1472_v35 = vpop.permute.xlu0 %1471 }
 0x22d   : > { %v1489_v55 = vsel %vm1487_vm9, %v1458_v43, %v1474_v39  ;;  %v1497_v49 = vsel %vm1487_vm9, %v1474_v39, %v1458_v43  ;;  %v1488_v58 = vsel %vm1487_vm9, %v1456_v28, %v1472_v35  ;;  %v1496_v25 = vsel %vm1487_vm9, %v1472_v35, %v1456_v28  ;;  %v4082_v43 = vld [vmem:[%s2122_s23 + $0x8] sm:$0xff] }
 0x22e   : > { %v1739_v39 = vadd.f32 %v4072_v27, %v4075_v16  ;;  %v1688_v28 = vcvt.s32.f32 %v4047_v3  ;;  %v1685_v35 = vcvt.s32.f32 %v4057_v61  ;;  %v4534_v3 = vcvt.s32.f32 %v4097_v59 }
 0x230   : > { %v1507_v8 = vpop.permute.xlu1 %1506  ;;  %v1505_v23 = vpop.permute.xlu0 %1504 }
 0x234   : > { %v1523_v32 = vpop.permute.xlu1 %1522  ;;  %v1521_v22 = vpop.permute.xlu0 %1520 }
 0x235   : > { %v1538_v48 = vsel %vm1536_vm8, %v1507_v8, %v1523_v32  ;;  %v1546_v12 = vsel %vm1536_vm8, %v1523_v32, %v1507_v8  ;;  %v1537_v36 = vsel %vm1536_vm8, %v1505_v23, %v1521_v22  ;;  %v1545_v44 = vsel %vm1536_vm8, %v1521_v22, %v1505_v23 }
 0x236   : > { %v1555_v63 = vmax.f32 %v1497_v49, %v1538_v48  ;;  %v1556_v31 = vmax.f32 %v1489_v55, %v1546_v12  ;;  %v1553_v11 = vmax.f32 %v1496_v25, %v1537_v36  ;;  %v1554_v1 = vmax.f32 %v1488_v58, %v1545_v44 }
 0x237   : > { %v1686_v32 = vcvt.s32.f32 %v4059_v5  ;;  %v1740_v22 = vadd.f32 %v4078_v17, %v4082_v43 }
 0x238   : > { %v1476_v30 = vpop.permute.xlu1 %1475  ;;  %v1460_v37 = vpop.permute.xlu0 %1459  ;;  %v1571_v48 = vmax.f32 %v3870_v4, %v1555_v63  ;;  %v1572_v12 = vmax.f32 %v3880_v14, %v1556_v31  ;;  %v1569_v55 = vmax.f32 %v3873_v57, %v1553_v11  ;;  %v4119_v57 = vadd.f32 %v1687_v60, %v1685_v35 }
 0x239   : > { %v1498_v4 = vsel %vm1487_vm9, %v1476_v30, %v1460_v37 }
 0x23a   : > { %vm1587_vm15 = vcmp.gt.f32.partialorder %v1571_v48, 0.001  ;;  %vm1588_vm2 = vcmp.gt.f32.partialorder %v1572_v12, 0.001  ;;  %vm1585_vm3 = vcmp.gt.f32.partialorder %v1569_v55, 0.001 }
 0x23c   : > { %v1525_v29 = vpop.permute.xlu1 %1524  ;;  %v1509_v19 = vpop.permute.xlu0 %1508 }
 0x23d   : > { %v1539_v7 = vsel %vm1536_vm8, %v1509_v19, %v1525_v29  ;;  %v1547_v33 = vsel %vm1536_vm8, %v1525_v29, %v1509_v19  ;;  %v1570_v29 = vmax.f32 %v3883_v24, %v1554_v1  ;;  %v1490_v19 = vsel %vm1487_vm9, %v1460_v37, %v1476_v30  ;;  %v4128_v30 = vld [vmem:[%s2122_s23 + $0x20] sm:$0xff]  ;;  %v4131_v37 = vld [vmem:[%s2122_s23 + $0x28] sm:$0xff] }
 0x23e   : > { %v1557_v14 = vmax.f32 %v1498_v4, %v1539_v7  ;;  %v1558_v20 = vmax.f32 %v1490_v19, %v1547_v33  ;;  %v4125_v24 = vadd.f32 %v1688_v28, %v1686_v32  ;;  %v4136_v63 = vadd.f32 %v1739_v39, %v4128_v30 }
 0x23f   : > { %v4139_v31 = vadd.f32 %v1740_v22, %v4131_v37  ;;  %vm1586_vm4 = vcmp.gt.f32.partialorder %v1570_v29, 0.001  ;;  %v4170_v29 = vsel %vm1585_vm3, 1.0, %v4400_v10 }
 0x240   : > { %v1478_v53 = vpop.permute.xlu1 %1477  ;;  %v1462_v41 = vpop.permute.xlu0 %1461  ;;  %v1574_v39 = vmax.f32 %v3909_v52, %v1558_v20 }
 0x241   : > { %v1491_v58 = vsel %vm1487_vm9, %v1462_v41, %v1478_v53 }
 0x242   : > { %vm1590_vm6 = vcmp.gt.f32.partialorder %v1574_v39, 0.001 }
 0x244   : > { %v1527_v38 = vpop.permute.xlu1 %1526  ;;  %v1511_v6 = vpop.permute.xlu0 %1510 }
 0x245   : > { %v1540_v36 = vsel %vm1536_vm8, %v1511_v6, %v1527_v38  ;;  %v1548_v44 = vsel %vm1536_vm8, %v1527_v38, %v1511_v6  ;;  %v1499_v38 = vsel %vm1487_vm9, %v1478_v53, %v1462_v41  ;;  %v1689_v53 = vcvt.s32.f32 %v4095_v9 }
 0x246   : > { %v1559_v6 = vmax.f32 %v1499_v38, %v1540_v36  ;;  %v1560_v25 = vmax.f32 %v1491_v58, %v1548_v44  ;;  %v4378_v41 = vcvt.s32.f32 %v4097_v59  ;;  %v1573_v36 = vmax.f32 %v3906_v45, %v1557_v14 }
 0x248   : > { %v4049_v18 = vpop.permute.xlu1 %1479  ;;  %v4051_v51 = vpop.permute.xlu0 %1463  ;;  %v1575_v44 = vmax.f32 %v3928_v15, %v1559_v6  ;;  %v1576_v22 = vmax.f32 %v3931_v56, %v1560_v25  ;;  %v4163_v15 = vsel %vm1587_vm15, 1.0, %v4400_v10  ;;  %v4167_v56 = vsel %vm1588_vm2, 1.0, %v4400_v10 }
 0x249   : > { %v1492_v19 = vsel %vm1487_vm9, %v4051_v51, %v4049_v18  ;;  %vm1589_vm5 = vcmp.gt.f32.partialorder %v1573_v36, 0.001  ;;  %v1705_v58 = vmul.f32 %v4163_v15, %v4072_v27  ;;  %v1706_v38 = vmul.f32 %v4167_v56, %v4078_v17 }
 0x24a   : > { %vm1591_vm7 = vcmp.gt.f32.partialorder %v1575_v44, 0.001  ;;  %vm1592_vm10 = vcmp.gt.f32.partialorder %v1576_v22, 0.001 }
 0x24b   : > { %v4196_v17 = vsel %vm1591_vm7, 1.0, %v4400_v10 }
 0x24c   : > { %v1529_v8 = vpop.permute.xlu1 %1528  ;;  %v1513_v23 = vpop.permute.xlu0 %1512 }
 0x24d   : > { %v1541_v11 = vsel %vm1536_vm8, %v1513_v23, %v1529_v8  ;;  %v1549_v1 = vsel %vm1536_vm8, %v1529_v8, %v1513_v23  ;;  %v1500_v8 = vsel %vm1487_vm9, %v4049_v18, %v4051_v51  ;;  %v4173_v18 = vsel %vm1586_vm4, 1.0, %v4400_v10 }
 0x24e   : > { %v1561_v23 = vmax.f32 %v1500_v8, %v1541_v11  ;;  %v1562_v55 = vmax.f32 %v1492_v19, %v1549_v1  ;;  %v1703_v11 = vmul.f32 %v4170_v29, %v4075_v16  ;;  %v4193_v1 = vsel %vm1590_vm6, 1.0, %v4400_v10 }
 0x24f   : > { %v1764_v61 = vmul.f32 %v4193_v1, %v4534_v3 }
 0x250   : > { %v1482_v49 = vpop.permute.xlu1 %1481  ;;  %v1466_v2 = vpop.permute.xlu0 %1465  ;;  %v1577_v6 = vmax.f32 %v3950_v0, %v1561_v23  ;;  %v1578_v25 = vmax.f32 %v3953_v40, %v1562_v55  ;;  %v4199_v0 = vsel %vm1592_vm10, 1.0, %v4400_v10  ;;  %v1719_v23 = vadd.f32 %v1705_v58, %v1703_v11 }
 0x251   : > { %v1493_v14 = vsel %vm1487_vm9, %v1466_v2, %v1482_v49  ;;  %v1501_v48 = vsel %vm1487_vm9, %v1482_v49, %v1466_v2  ;;  %v1704_v49 = vmul.f32 %v4173_v18, %v4082_v43  ;;  %v4190_v2 = vsel %vm1589_vm5, 1.0, %v4400_v10  ;;  %v1639_v43 = vld [vmem:[%s2122_s23 + $0x30] sm:$0xff] }
 0x252   : > { %vm1593_vm11 = vcmp.gt.f32.partialorder %v1577_v6, 0.001  ;;  %vm1594_vm14 = vcmp.gt.f32.partialorder %v1578_v25, 0.001  ;;  %v1763_v13 = vmul.f32 %v4190_v2, %v1689_v53 }
 0x253   : > { %v1720_v55 = vadd.f32 %v1706_v38, %v1704_v49  ;;  %v4225_v58 = vsel %vm1593_vm11, 1.0, %v4400_v10  ;;  %v1660_v38 = vunpack.c.3.s8 %v4033_v21 }
 0x254   : > { %v1531_v7 = vpop.permute.xlu1 %1530  ;;  %v1515_v33 = vpop.permute.xlu0 %1514 }
 0x255   : > { %v1542_v45 = vsel %vm1536_vm8, %v1515_v33, %v1531_v7  ;;  %v1550_v52 = vsel %vm1536_vm8, %v1531_v7, %v1515_v33  ;;  %v1640_v33 = vld [vmem:[%s2122_s23 + $0x38] sm:$0xff] }
 0x256   : > { %v1563_v12 = vmax.f32 %v1501_v48, %v1542_v45  ;;  %v1564_v20 = vmax.f32 %v1493_v14, %v1550_v52  ;;  %v1707_v45 = vmul.f32 %v4190_v2, %v4128_v30  ;;  %v1709_v14 = vmul.f32 %v4196_v17, %v1639_v43 }
 0x257   : > { %v1710_v48 = vmul.f32 %v4199_v0, %v1640_v33  ;;  %v4229_v30 = vsel %vm1594_vm14, 1.0, %v4400_v10 }
 0x258   : > { %v1484_v51 = vpop.permute.xlu1 %1483  ;;  %v1468_v4 = vpop.permute.xlu0 %1467  ;;  %v1579_v36 = vmax.f32 %v3968_v42, %v1563_v12  ;;  %v1580_v39 = vmax.f32 %v3971_v47, %v1564_v20  ;;  %v1708_v42 = vmul.f32 %v4193_v1, %v4131_v37  ;;  %v1641_v12 = vld [vmem:[%s2122_s23 + $0x40] sm:$0xff]  ;;  %v1659_v37 = vunpack.c.3.s8 %v4030_v26 }
 0x259   : > { %v1494_v44 = vsel %vm1487_vm9, %v1468_v4, %v1484_v51  ;;  %v1502_v22 = vsel %vm1487_vm9, %v1484_v51, %v1468_v4  ;;  %v1642_v51 = vld [vmem:[%s2122_s23 + $0x48] sm:$0xff]  ;;  %v1721_v11 = vadd.f32 %v1719_v23, %v1707_v45 }
 0x25a   : > { %vm1595_vm0 = vcmp.gt.f32.partialorder %v1579_v36, 0.001  ;;  %vm1596_vm12 = vcmp.gt.f32.partialorder %v1580_v39, 0.001  ;;  %v1722_v6 = vadd.f32 %v1720_v55, %v1708_v42 }
 0x25b   : > { %v4238_v26 = vsel %vm1595_vm0, 1.0, %v4400_v10  ;;  %v4241_v21 = vsel %vm1596_vm12, 1.0, %v4400_v10 }
 0x25c   : > { %v1533_v27 = vpop.permute.xlu1 %1532  ;;  %v1517_v7 = vpop.permute.xlu0 %1516 }
 0x25d   : > { %v1543_v40 = vsel %vm1536_vm8, %v1517_v7, %v1533_v27  ;;  %v1551_v16 = vsel %vm1536_vm8, %v1533_v27, %v1517_v7  ;;  %v1711_v27 = vmul.f32 %v4225_v58, %v1641_v12  ;;  %v1712_v7 = vmul.f32 %v4229_v30, %v1642_v51 }
 0x25e   : > { %v1565_v19 = vmax.f32 %v1502_v22, %v1543_v40  ;;  %v1566_v8 = vmax.f32 %v1494_v44, %v1551_v16  ;;  %v1723_v40 = vadd.f32 %v1721_v11, %v1709_v14  ;;  %v1724_v16 = vadd.f32 %v1722_v6, %v1710_v48  ;;  %v1645_v44 = vld [vmem:[%s2122_s23 + $0x60] sm:$0xff]  ;;  %v1646_v22 = vld [vmem:[%s2122_s23 + $0x68] sm:$0xff] }
 0x25f   : > { %v4266_v14 = vadd.f32 %v4119_v57, %v1689_v53  ;;  %v4271_v48 = vadd.f32 %v4125_v24, %v4378_v41  ;;  %v4281_v57 = vand.u32 255, %v1660_v38  ;;  %v1647_v24 = vld [vmem:[%s2122_s23 + $0x70] sm:$0xff] }
 0x260   : > { %v1486_v47 = vpop.permute.xlu1 %1485  ;;  %v1470_v52 = vpop.permute.xlu0 %1469  ;;  %v1581_v4 = vmax.f32 %v3990_v46, %v1565_v19  ;;  %v1582_v20 = vmax.f32 %v3993_v34, %v1566_v8  ;;  %v1743_v46 = vadd.f32 %v4136_v63, %v1639_v43  ;;  %v1744_v34 = vadd.f32 %v4139_v31, %v1640_v33  ;;  %v1643_v63 = vld [vmem:[%s2122_s23 + $0x50] sm:$0xff]  ;;  %v1644_v31 = vld [vmem:[%s2122_s23 + $0x58] sm:$0xff] }
 0x261   : > { %v1495_v19 = vsel %vm1487_vm9, %v1470_v52, %v1486_v47  ;;  %v1503_v8 = vsel %vm1487_vm9, %v1486_v47, %v1470_v52  ;;  %v1713_v23 = vmul.f32 %v4238_v26, %v1643_v63  ;;  %v1714_v55 = vmul.f32 %v4241_v21, %v1644_v31  ;;  %v1651_v52 = vld [vmem:[%s2127_s27 + $0x10] sm:$0xff] }
 0x262   : > { %vm1597_vm13 = vcmp.gt.f32.partialorder %v1581_v4, 0.001  ;;  %vm1598_vm1 = vcmp.gt.f32.partialorder %v1582_v20, 0.001  ;;  %v1725_v62 = vadd.f32 %v1723_v40, %v1711_v27  ;;  %v1726_v47 = vadd.f32 %v1724_v16, %v1712_v7  ;;  %v1652_v4 = vld [vmem:[%s2127_s27 + $0x18] sm:$0xff] }
 0x263   : > { %v4250_v36 = vsel %vm1597_vm13, 1.0, %v4400_v10  ;;  %v4253_v39 = vsel %vm1598_vm1, 1.0, %v4400_v10  ;;  %v1661_v40 = vunpack.c.0.s8 %v1651_v52  ;;  %v1662_v16 = vunpack.c.0.s8 %v1652_v4 }
 0x264   : > { %v1535_v25 = vpop.permute.xlu1 %1534  ;;  %v1519_v49 = vpop.permute.xlu0 %1518  ;;  %v1715_v20 = vmul.f32 %v4250_v36, %v1645_v44  ;;  %v1716_v11 = vmul.f32 %v4253_v39, %v1646_v22  ;;  %v1727_v27 = vadd.f32 %v1725_v62, %v1713_v23  ;;  %v1728_v7 = vadd.f32 %v1726_v47, %v1714_v55  ;;  %v1701_v55 = vld [vmem:[%s2137_s9] sm:$0xff] }
 0x265   : > { %v1544_v43 = vsel %vm1536_vm8, %v1519_v49, %v1535_v25  ;;  %v1552_v33 = vsel %vm1536_vm8, %v1535_v25, %v1519_v49  ;;  %v4279_v49 = vand.u32 255, %v1659_v37  ;;  %v1664_v23 = vunpack.c.1.s8 %v1652_v4 }
 0x266   : > { %v1567_v45 = vmax.f32 %v1503_v8, %v1544_v43  ;;  %v1568_v42 = vmax.f32 %v1495_v19, %v1552_v33  ;;  %v1745_v43 = vadd.f32 %v1743_v46, %v1641_v12  ;;  %v1746_v33 = vadd.f32 %v1744_v34, %v1642_v51  ;;  %v1648_v19 = vld [vmem:[%s2122_s23 + $0x78] sm:$0xff] }
 0x267   : > { %v1729_v37 = vadd.f32 %v1727_v27, %v1715_v20  ;;  %v1730_v38 = vadd.f32 %v1728_v7, %v1716_v11  ;;  %v1691_v46 = vcvt.s32.f32 %v4279_v49  ;;  %v1692_v34 = vcvt.s32.f32 %v4281_v57 }
 0x268   : > { %v1583_v6 = vmax.f32 %v4012_v54, %v1567_v45  ;;  %v1584_v25 = vmax.f32 %v4015_v50, %v1568_v42  ;;  %v1663_v8 = vunpack.c.1.s8 %v1651_v52  ;;  %v1702_v45 = vld [vmem:[%s2137_s9 + $0x8] sm:$0xff]  ;;  %v1747_v42 = vadd.f32 %v1745_v43, %v1643_v63 }
 0x269   : > { %v1748_v62 = vadd.f32 %v1746_v33, %v1644_v31  ;;  %v1678_v20 = vand.u32 255, %v1662_v16  ;;  %v1665_v11 = vunpack.c.2.s8 %v1651_v52  ;;  %v1667_v27 = vunpack.c.3.s8 %v1651_v52 }
 0x26a   : > { %vm1599_vm8 = vcmp.gt.f32.partialorder %v1583_v6, 0.001  ;;  %vm1600_vm9 = vcmp.gt.f32.partialorder %v1584_v25, 0.001  ;;  %v1666_v25 = vunpack.c.2.s8 %v1652_v4  ;;  %v1668_v7 = vunpack.c.3.s8 %v1652_v4 }
 0x26b   : > { %v4286_v54 = vsel %vm1599_vm8, 1.0, %v4400_v10  ;;  %v4289_v50 = vsel %vm1600_vm9, 1.0, %v4400_v10  ;;  %v1677_v10 = vand.u32 255, %v1661_v40  ;;  %v1761_v57 = vmul.f32 %v4163_v15, %v1687_v60 }
 0x26c   : > { %v1717_v12 = vmul.f32 %v4286_v54, %v1647_v24  ;;  %v1718_v51 = vmul.f32 %v4289_v50, %v1648_v19  ;;  %v1762_v63 = vmul.f32 %v4167_v56, %v1688_v28  ;;  %v1759_v31 = vmul.f32 %v4170_v29, %v1685_v35 }
 0x26d   : > { %v1760_v43 = vmul.f32 %v4173_v18, %v1686_v32  ;;  %v1679_v52 = vand.u32 255, %v1663_v8  ;;  %v1680_v4 = vand.u32 255, %v1664_v23  ;;  %v1749_v33 = vadd.f32 %v1747_v42, %v1645_v44 }
 0x26e   : > { %v1731_v47 = vadd.f32 %v1729_v37, %v1717_v12  ;;  %v1732_v6 = vadd.f32 %v1730_v38, %v1718_v51  ;;  %v1750_v40 = vadd.f32 %v1748_v62, %v1646_v22  ;;  %v1693_v60 = vcvt.s32.f32 %v1677_v10 }
 0x26f   : > { %v1694_v28 = vcvt.s32.f32 %v1678_v20  ;;  %v1681_v35 = vand.u32 255, %v1665_v11  ;;  %v1682_v5 = vand.u32 255, %v1666_v25  ;;  %v1683_v15 = vand.u32 255, %v1667_v27  ;;  %v1757_v27 = vld [vmem:[%s2137_s9 + $0x20] sm:$0xff] }
 0x270   : > { %v1733_v41 = vadd.f32 %v1731_v47, %v1701_v55  ;;  %v1734_v49 = vadd.f32 %v1732_v6, %v1702_v45  ;;  %v1684_v32 = vand.u32 255, %v1668_v7  ;;  %v1775_v56 = vadd.f32 %v1761_v57, %v1759_v31  ;;  %v1758_v7 = vld [vmem:[%s2137_s9 + $0x28] sm:$0xff] }
 0x271   : > { %v1776_v29 = vadd.f32 %v1762_v63, %v1760_v43  ;;  %v1765_v18 = vmul.f32 %v4196_v17, %v1691_v46  ;;  %v1695_v44 = vcvt.s32.f32 %v1679_v52  ;;  %v1696_v9 = vcvt.s32.f32 %v1680_v4  ;;  %v1793_v43 = vld [vmem:[%s2137_s9 + $0x30] sm:$0xff]  ;;  %v1794_v52 = vld [vmem:[%s2137_s9 + $0x38] sm:$0xff] }
 0x272   : > { %1735 = vst [vmem:[%s2137_s9] sm:$0xff] %v1733_v41  ;;  %1736 = vst [vmem:[%s2137_s9 + $0x8] sm:$0xff] %v1734_v49  ;;  %v1766_v41 = vmul.f32 %v4199_v0, %v1692_v34  ;;  %v1751_v53 = vadd.f32 %v1749_v33, %v1647_v24  ;;  %v1752_v59 = vadd.f32 %v1750_v40, %v1648_v19  ;;  %v1697_v12 = vcvt.s32.f32 %v1681_v35  ;;  %v1737_v24 = vld [vmem:[%s2137_s9 + $0x10] sm:$0xff]  ;;  %v1738_v19 = vld [vmem:[%s2137_s9 + $0x18] sm:$0xff] }
 0x273   : > { %v1777_v2 = vadd.f32 %v1775_v56, %v1763_v13  ;;  %v1778_v1 = vadd.f32 %v1776_v29, %v1764_v61  ;;  %v1799_v22 = vadd.f32 %v4266_v14, %v1691_v46  ;;  %v1800_v16 = vadd.f32 %v4271_v48, %v1692_v34 }
 0x274   : > { %v1767_v37 = vmul.f32 %v4225_v58, %v1693_v60  ;;  %v1768_v38 = vmul.f32 %v4229_v30, %v1694_v28  ;;  %v1698_v17 = vcvt.s32.f32 %v1682_v5  ;;  %v1699_v8 = vcvt.s32.f32 %v1683_v15 }
 0x275   : > { %v1779_v0 = vadd.f32 %v1777_v2, %v1765_v18  ;;  %v1780_v51 = vadd.f32 %v1778_v1, %v1766_v41  ;;  %v1700_v23 = vcvt.s32.f32 %v1684_v32  ;;  %v1769_v55 = vmul.f32 %v4238_v26, %v1695_v44 }
 0x276   : > { %v1770_v14 = vmul.f32 %v4241_v21, %v1696_v9  ;;  %v1753_v46 = vadd.f32 %v1751_v53, %v1737_v24  ;;  %v1754_v48 = vadd.f32 %v1752_v59, %v1738_v19  ;;  %v1771_v30 = vmul.f32 %v4250_v36, %v1697_v12 }
 0x277   : > { %v1781_v34 = vadd.f32 %v1779_v0, %v1767_v37  ;;  %v1782_v58 = vadd.f32 %v1780_v51, %v1768_v38  ;;  %v1772_v45 = vmul.f32 %v4253_v39, %v1698_v17  ;;  %v1801_v42 = vadd.f32 %v1799_v22, %v1693_v60 }
 0x278   : > { %1755 = vst [vmem:[%s2137_s9 + $0x10] sm:$0xff] %v1753_v46  ;;  %1756 = vst [vmem:[%s2137_s9 + $0x18] sm:$0xff] %v1754_v48  ;;  %v1802_v62 = vadd.f32 %v1800_v16, %v1694_v28  ;;  %v1773_v26 = vmul.f32 %v4286_v54, %v1699_v8  ;;  %v1774_v21 = vmul.f32 %v4289_v50, %v1700_v23 }
 0x279   : > { %v1783_v47 = vadd.f32 %v1781_v34, %v1769_v55  ;;  %v1784_v6 = vadd.f32 %v1782_v58, %v1770_v14  ;;  %v1803_v36 = vadd.f32 %v1801_v42, %v1695_v44 }
 0x27a   : > { %v1804_v11 = vadd.f32 %v1802_v62, %v1696_v9 }
 0x27b   : > { %v1785_v10 = vadd.f32 %v1783_v47, %v1771_v30  ;;  %v1786_v20 = vadd.f32 %v1784_v6, %v1772_v45  ;;  %v1805_v63 = vadd.f32 %v1803_v36, %v1697_v12 }
 0x27c   : > { %v1806_v31 = vadd.f32 %v1804_v11, %v1698_v17 }
 0x27d   : > { %v1787_v39 = vadd.f32 %v1785_v10, %v1773_v26  ;;  %v1788_v25 = vadd.f32 %v1786_v20, %v1774_v21  ;;  %v1807_v54 = vadd.f32 %v1805_v63, %v1699_v8 }
 0x27e   : > { %v1808_v50 = vadd.f32 %v1806_v31, %v1700_v23 }
 0x27f   : > { %v1789_v49 = vadd.f32 %v1787_v39, %v1757_v27  ;;  %v1790_v57 = vadd.f32 %v1788_v25, %v1758_v7  ;;  %v1809_v4 = vadd.f32 %v1807_v54, %v1793_v43 }
 0x280   : > { %v1810_v33 = vadd.f32 %v1808_v50, %v1794_v52 }
 0x281   : > { %1791 = vst [vmem:[%s2137_s9 + $0x20] sm:$0xff] %v1789_v49  ;;  %1792 = vst [vmem:[%s2137_s9 + $0x28] sm:$0xff] %v1790_v57 }
 0x282   : > { %1811 = vst [vmem:[%s2137_s9 + $0x30] sm:$0xff] %v1809_v4  ;;  %1812 = vst [vmem:[%s2137_s9 + $0x38] sm:$0xff] %v1810_v33 }
 0x283 PF: > { %s13_s14 = sadd.s32 1, %s2068_s14   ;;  %s4535_s12 = smov %s2064_s13 }
 0x284   : > { %p10_p7 = scmp.ge.s32.totalorder %s13_s14, 4   ;;  %s4536_s13 = smov %s4538_s15 }
 0x286   :  { %12 = sbr.rel (!%p10_p7) target bundleno = 2 (0x2), region = 162 }
 0x28d   :  { %1837 = vsyncmov [#allocation3] }
 0x290   :  { %s1838_s18 = vpop.sfrf %1837 }
 0x291   :  { %p2006_p8 = scmp.ne.s32.totalorder %s1838_s18, 0 }
 0x293   :  { %1842 = shalt.err (%p2006_p8)  }
 0x294   :  { %1844 = vsyncmov [#allocation3 + $0x1] }
 0x297   :  { %s1845_s19 = vpop.sfrf %1844 }
 0x298   :  { %p2007_p9 = scmp.ne.s32.totalorder %s1845_s19, 0 }
 0x29a   :  { %1849 = shalt.err (%p2007_p9)  }

</bundles_post_ra>
